<compile_context>
chip_gen: v6e
topology: v6e:2x2x1
jax: 0.10.0
libtpu: 0.0.40
codegen_flags: <defaults>
</compile_context>

<pallas_src>
import jax
import jax.numpy as jnp
import numpy as np
from jax.experimental import pallas as pl
from jax.experimental.pallas import tpu as pltpu


# Parameter packing offsets inside the flat SMEM params array
_CAM_BASE = 0    # 1/fx, 1/fy, cx, cy, k1, k2, p1, p2, k3   (9 values)
_PRJ_BASE = 9    # 1/fx, 1/fy, cx, cy, k1, k2, p1, p2, k3   (9 values)
_R_BASE = 18     # R row-major                               (9 values)
_T_BASE = 27     # T                                         (3 values)
_N_PARAMS = 30

_LANES = 128


def _plane_refine_kernel(params_ref, cu_ref, cv_ref, pu_ref, pv_ref,
                         ox_ref, oy_ref, oz_ref, err_ref):
    """One (batch, point-block) step.

    cu/cv/pu/pv : (S, 128) VMEM   camera / projector pixel u, v planes
    ox/oy/oz    : (S, 128) VMEM   triangulated 3D point coords (camera frame)
    err         : (S, 128) VMEM   ray-ray distance per point
    params_ref  : (30,)   SMEM    packed calibration scalars
    """

    def refined_recip(d):
        # EUP approximate reciprocal + ONE Newton step (~f32-exact).
        # The NR step is kept deliberately (also inside undistort): reciprocal
        # error is amplified by the 2x2-solve conditioning and caused the
        # previous accuracy failure; the step costs only 3 VALU ops.
        r = pl.reciprocal(d, approx=True)
        return r * (2.0 - d * r)

    def undistort(u, v, base):
        inv_fx = params_ref[base + 0]
        inv_fy = params_ref[base + 1]
        cx = params_ref[base + 2]
        cy = params_ref[base + 3]
        k1 = params_ref[base + 4]
        k2 = params_ref[base + 5]
        p1 = params_ref[base + 6]
        p2 = params_ref[base + 7]
        k3 = params_ref[base + 8]
        two_p1 = 2.0 * p1          # scalar ALU, hoisted out of the vector loop
        two_p2 = 2.0 * p2
        x = (u - cx) * inv_fx
        y = (v - cy) * inv_fy
        x0, y0 = x, y
        # OpenCV-style iterative undistortion (fixed 5 iterations, pure VPU/EUP)
        for _ in range(5):
            # explicit CSE: each of x*x, y*y, x*y is used twice below
            xx = x * x
            yy = y * y
            xy = x * y
            r2 = xx + yy
            kinv = refined_recip(1.0 + r2 * (k1 + r2 * (k2 + r2 * k3)))
            dx = two_p1 * xy + p2 * (r2 + 2.0 * xx)
            dy = p1 * (r2 + 2.0 * yy) + two_p2 * xy
            x = (x0 - dx) * kinv
            y = (y0 - dy) * kinv
        return x, y

    # full (S, 128) tiles
    xc, yc = undistort(cu_ref[...], cv_ref[...], _CAM_BASE)
    xp, yp = undistort(pu_ref[...], pv_ref[...], _PRJ_BASE)

    R = [[params_ref[_R_BASE + 3 * i + j] for j in range(3)] for i in range(3)]
    T0 = params_ref[_T_BASE + 0]
    T1 = params_ref[_T_BASE + 1]
    T2 = params_ref[_T_BASE + 2]

    # camera ray rotated into the projector frame: d1 = R @ [xc, yc, 1]
    d1x = R[0][0] * xc + R[0][1] * yc + R[0][2]
    d1y = R[1][0] * xc + R[1][1] * yc + R[1][2]
    d1z = R[2][0] * xc + R[2][1] * yc + R[2][2]
    # projector ray direction is [xp, yp, 1]; the constant 1 is folded below.

    # least squares:  [d1, -d2] [z1, z2]^T = -T  (2x2 normal equations)
    a11 = d1x * d1x + d1y * d1y + d1z * d1z
    a22 = xp * xp + yp * yp + 1.0
    a12 = d1x * xp + d1y * yp + d1z
    b1 = -(d1x * T0 + d1y * T1 + d1z * T2)
    b2 = xp * T0 + yp * T1 + T2

    # NOTE: no guard against det ~ 0 (degenerate, near-parallel rays) to match
    # the PyTorch reference behaviour exactly.
    inv_det = refined_recip(a11 * a22 - a12 * a12)
    z1 = (a22 * b1 + a12 * b2) * inv_det
    z2 = (a12 * b1 + a11 * b2) * inv_det

    # 3D point in the CAMERA frame: z1 * [xc, yc, 1]
    ox_ref[...] = z1 * xc
    oy_ref[...] = z1 * yc
    oz_ref[...] = z1

    # triangulation error = distance between closest points of the two rays
    rx = z1 * d1x + T0 - z2 * xp
    ry = z1 * d1y + T1 - z2 * yp
    rz = z1 * d1z + T2 - z2
    err_ref[...] = jnp.sqrt(rx * rx + ry * ry + rz * rz)


def _pack_params(R, T, camera_mtx, camera_dist, projector_mtx, projector_dist):
    def intr(mtx, dist):
        fx = mtx[0, 0].astype(jnp.float32)
        fy = mtx[1, 1].astype(jnp.float32)
        cx = mtx[0, 2].astype(jnp.float32)
        cy = mtx[1, 2].astype(jnp.float32)
        return jnp.concatenate([
            jnp.stack([1.0 / fx, 1.0 / fy, cx, cy]),
            dist.reshape(-1).astype(jnp.float32),
        ])

    return jnp.concatenate([
        intr(camera_mtx, camera_dist),
        intr(projector_mtx, projector_dist),
        R.reshape(-1).astype(jnp.float32),
        T.reshape(-1).astype(jnp.float32),
    ])


def _choose_block_rows(nb0, batch, max_block_rows):
    """Pick the sublane block size S (in 128-lane rows)."""
    if nb0 <= 8:
        # full-extent block (legal even when not a multiple of 8)
        return nb0
    if batch == 1:
        # v7x: make sure there are >= 2 grid blocks so both TensorCores work
        target = max(8, (nb0 + 1) // 2)
    else:
        target = nb0
    target = ((target + 7) // 8) * 8
    return min(max_block_rows, target)


def plane_refine_batch(camera_points, projector_points,
                       R, T, camera_mtx, camera_dist,
                       projector_mtx, projector_dist, *,
                       max_block_rows=512, interleave_output=True):
    """camera_points / projector_points: (B, N, 2) pixel coords.

    Returns (pts, error): pts (B, N, 3) in the camera frame, error (B, N).
    With interleave_output=False, pts comes back planar as (B, 3, N), which
    skips the point-major interleave relayout (cheaper for large N)."""
    B, N, _ = camera_points.shape

    params = _pack_params(R, T, camera_mtx, camera_dist,
                          projector_mtx, projector_dist)
    assert params.shape == (_N_PARAMS,)

    nb0 = -(-N // _LANES)                 # ceil(N / 128)
    S = _choose_block_rows(nb0, B, max_block_rows)
    NB = -(-nb0 // S) * S                 # pad row count so S divides it
    Np = NB * _LANES
    grid = (B, NB // S)

    def split_planes(pts):
        p = pts.astype(jnp.float32)
        if Np != N:
            p = jnp.pad(p, ((0, 0), (0, Np - N), (0, 0)))
        # (B, Np, 2) -> two contiguous (B, NB, 128) planes (cheap strided slice)
        u = p[..., 0].reshape(B, NB, _LANES)
        v = p[..., 1].reshape(B, NB, _LANES)
        return u, v

    cu, cv = split_planes(camera_points)
    pu, pv = split_planes(projector_points)

    plane_spec = pl.BlockSpec((None, S, _LANES), lambda b, n: (b, n, 0))
    plane_shape = jax.ShapeDtypeStruct((B, NB, _LANES), jnp.float32)

    total_pts = B * Np
    cost = pl.CostEstimate(flops=320 * total_pts,
                           transcendentals=12 * total_pts,
                           bytes_accessed=32 * total_pts)

    ox, oy, oz, err = pl.pallas_call(
        _plane_refine_kernel,
        out_shape=(plane_shape, plane_shape, plane_shape, plane_shape),
        grid=grid,
        in_specs=[
            pl.BlockSpec(memory_space=pltpu.SMEM),     # packed calibration params
            plane_spec, plane_spec,                    # camera u, v
            plane_spec, plane_spec,                    # projector u, v
        ],
        out_specs=(plane_spec, plane_spec, plane_spec, plane_spec),
        compiler_params=pltpu.CompilerParams(
            dimension_semantics=("parallel", "parallel")),
        cost_estimate=cost,
    )(params, cu, cv, pu, pv)

    error = err.reshape(B, Np)[:, :N]
    if interleave_output:
        # module contract: (B, N, 3) — one relayout pass
        pts = jnp.stack([ox, oy, oz], axis=-1).reshape(B, Np, 3)[:, :N, :]
        return pts, error
    # planar (B, 3, N): contiguous concat, no lane interleave
    pts_planar = jnp.stack([ox, oy, oz], axis=1).reshape(B, 3, Np)[:, :, :N]
    return pts_planar, error


# ------------------------- pure-JAX reference -------------------------------
def _triangulation_ref(cam_pts, prj_pts, R, T, cm, cd, pm, pd):
    def undist(pts, mtx, dist):
        fx, fy, cx, cy = mtx[0, 0], mtx[1, 1], mtx[0, 2], mtx[1, 2]
        k1, k2, p1, p2, k3 = dist
        x = (pts[..., 0] - cx) / fx
        y = (pts[..., 1] - cy) / fy
        x0, y0 = x, y
        for _ in range(5):
            r2 = x * x + y * y
            kinv = 1.0 / (1.0 + r2 * (k1 + r2 * (k2 + r2 * k3)))
            dx = 2 * p1 * x * y + p2 * (r2 + 2 * x * x)
            dy = p1 * (r2 + 2 * y * y) + 2 * p2 * x * y
            x = (x0 - dx) * kinv
            y = (y0 - dy) * kinv
        return x, y

    xc, yc = undist(cam_pts, cm, cd)
    xp, yp = undist(prj_pts, pm, pd)
    Tv = T.reshape(3)
    # explicit R expansion (avoids TPU reduced-precision matmul in the ref)
    d1x = R[0, 0] * xc + R[0, 1] * yc + R[0, 2]
    d1y = R[1, 0] * xc + R[1, 1] * yc + R[1, 2]
    d1z = R[2, 0] * xc + R[2, 1] * yc + R[2, 2]
    a11 = d1x * d1x + d1y * d1y + d1z * d1z
    a22 = xp * xp + yp * yp + 1.0
    a12 = d1x * xp + d1y * yp + d1z
    b1 = -(d1x * Tv[0] + d1y * Tv[1] + d1z * Tv[2])
    b2 = xp * Tv[0] + yp * Tv[1] + Tv[2]
    det = a11 * a22 - a12 * a12
    z1 = (a22 * b1 + a12 * b2) / det
    z2 = (a12 * b1 + a11 * b2) / det
    pts = jnp.stack([z1 * xc, z1 * yc, z1], -1)
    rx = z1 * d1x + Tv[0] - z2 * xp
    ry = z1 * d1y + Tv[1] - z2 * yp
    rz = z1 * d1z + Tv[2] - z2
    err = jnp.sqrt(rx * rx + ry * ry + rz * rz)
    return pts, err


if __name__ == "__main__":
    B, N = 2, 1000   # N deliberately not a multiple of 128 to exercise padding

    # Deterministic "calibration" parameters (synthetic, matching __init__ shapes)
    ang = 0.1
    R_np = np.array([[np.cos(ang), 0.0, np.sin(ang)],
                     [0.0, 1.0, 0.0],
                     [-np.sin(ang), 0.0, np.cos(ang)]], np.float64)
    T_np = np.array([[-100.0], [5.0], [10.0]], np.float64)               # (3, 1)
    camera_mtx_np = np.array([[1000.0, 0.0, 320.0],
                              [0.0, 1000.0, 240.0],
                              [0.0, 0.0, 1.0]], np.float64)
    camera_dist_np = np.array([0.01, -0.002, 0.0005, 0.0003, 0.0001], np.float64)
    projector_mtx_np = np.array([[1200.0, 0.0, 512.0],
                                 [0.0, 1200.0, 384.0],
                                 [0.0, 0.0, 1.0]], np.float64)
    projector_dist_np = np.array([-0.005, 0.001, 0.0002, -0.0004, 0.00005],
                                 np.float64)

    # Geometrically consistent correspondences: sample 3D points in front of
    # the camera and project them (with distortion) into both camera and
    # projector.  This keeps the 2x2 triangulation solve well conditioned —
    # purely random, inconsistent pixel pairs (previous test) produce
    # near-parallel rays where ANY f32 implementation diverges.
    key = jax.random.PRNGKey(0)
    kx, ky, kz = jax.random.split(key, 3)
    xn = np.asarray(jax.random.uniform(kx, (B, N), jnp.float32, -0.25, 0.25),
                    np.float64)
    yn = np.asarray(jax.random.uniform(ky, (B, N), jnp.float32, -0.25, 0.25),
                    np.float64)
    Z = np.asarray(jax.random.uniform(kz, (B, N), jnp.float32, 300.0, 900.0),
                   np.float64)
    P_cam = np.stack([xn * Z, yn * Z, Z], axis=-1)            # (B, N, 3)
    P_prj = P_cam @ R_np.T + T_np.reshape(3)

    def project(P, mtx, dist):
        x = P[..., 0] / P[..., 2]
        y = P[..., 1] / P[..., 2]
        k1, k2, p1, p2, k3 = dist
        r2 = x * x + y * y
        rad = 1.0 + r2 * (k1 + r2 * (k2 + r2 * k3))
        xd = x * rad + 2 * p1 * x * y + p2 * (r2 + 2 * x * x)
        yd = y * rad + p1 * (r2 + 2 * y * y) + 2 * p2 * x * y
        u = mtx[0, 0] * xd + mtx[0, 2]
        v = mtx[1, 1] * yd + mtx[1, 2]
        return np.stack([u, v], axis=-1)

    camera_points = jnp.asarray(project(P_cam, camera_mtx_np, camera_dist_np),
                                jnp.float32)
    projector_points = jnp.asarray(project(P_prj, projector_mtx_np,
                                           projector_dist_np), jnp.float32)

    R = jnp.asarray(R_np, jnp.float32)
    T = jnp.asarray(T_np, jnp.float32)
    camera_mtx = jnp.asarray(camera_mtx_np, jnp.float32)
    camera_dist = jnp.asarray(camera_dist_np, jnp.float32)
    projector_mtx = jnp.asarray(projector_mtx_np, jnp.float32)
    projector_dist = jnp.asarray(projector_dist_np, jnp.float32)

    pts, err = plane_refine_batch(camera_points, projector_points,
                                  R, T, camera_mtx, camera_dist,
                                  projector_mtx, projector_dist)
    jax.block_until_ready((pts, err))

    # kernel vs pure-JAX reference
    pts_ref, err_ref = _triangulation_ref(camera_points, projector_points,
                                          R, T, camera_mtx, camera_dist,
                                          projector_mtx, projector_dist)
    np.testing.assert_allclose(np.asarray(pts), np.asarray(pts_ref),
                               rtol=2e-3, atol=2e-2)
    np.testing.assert_allclose(np.asarray(err), np.asarray(err_ref),
                               rtol=2e-3, atol=2e-2)
    # loose end-to-end geometry check against the ground-truth 3D points
    np.testing.assert_allclose(np.asarray(pts), P_cam.astype(np.float32),
                               rtol=1e-2, atol=1.0)

    assert pts.shape == (B, N, 3) and err.shape == (B, N)
    print("KERNEL_OK")
</pallas_src>

<mosaic_0001>
module attributes {stable_mosaic.version = 11 : i64} {
  func.func @_plane_refine_kernel(%arg0: i32, %arg1: i32, %arg2: memref<30xf32, #tpu.memory_space<smem>>, %arg3: memref<1x8x128xf32, #tpu.memory_space<vmem>>, %arg4: memref<1x8x128xf32, #tpu.memory_space<vmem>>, %arg5: memref<1x8x128xf32, #tpu.memory_space<vmem>>, %arg6: memref<1x8x128xf32, #tpu.memory_space<vmem>>, %arg7: memref<1x8x128xf32, #tpu.memory_space<vmem>>, %arg8: memref<1x8x128xf32, #tpu.memory_space<vmem>>, %arg9: memref<1x8x128xf32, #tpu.memory_space<vmem>>, %arg10: memref<1x8x128xf32, #tpu.memory_space<vmem>>) attributes {dimension_semantics = [#tpu.dimension_semantics<parallel>, #tpu.dimension_semantics<parallel>], iteration_bounds = array<i64: 2, 1>, scalar_prefetch = 0 : i64, scratch_operands = 0 : i64, tpu.core_type = #tpu.core_type<tc>, window_params = [{transform_indices = @transform_0, window_bounds = array<i64: 30>}, {transform_indices = @transform_1, window_bounds = array<i64: 1, 8, 128>}, {transform_indices = @transform_2, window_bounds = array<i64: 1, 8, 128>}, {transform_indices = @transform_3, window_bounds = array<i64: 1, 8, 128>}, {transform_indices = @transform_4, window_bounds = array<i64: 1, 8, 128>}, {transform_indices = @transform_5, window_bounds = array<i64: 1, 8, 128>}, {transform_indices = @transform_6, window_bounds = array<i64: 1, 8, 128>}, {transform_indices = @transform_7, window_bounds = array<i64: 1, 8, 128>}, {transform_indices = @transform_8, window_bounds = array<i64: 1, 8, 128>}]} {
    %c0 = arith.constant 0 : index
    %c0_0 = arith.constant 0 : index
    %c0_1 = arith.constant 0 : index
    %0 = vector.load %arg3[%c0, %c0_0, %c0_1] : memref<1x8x128xf32, #tpu.memory_space<vmem>>, vector<1x8x128xf32>
    %1 = vector.shape_cast %0 : vector<1x8x128xf32> to vector<8x128xf32>
    %c0_2 = arith.constant 0 : index
    %c0_3 = arith.constant 0 : index
    %c0_4 = arith.constant 0 : index
    %2 = vector.load %arg4[%c0_2, %c0_3, %c0_4] : memref<1x8x128xf32, #tpu.memory_space<vmem>>, vector<1x8x128xf32>
    %3 = vector.shape_cast %2 : vector<1x8x128xf32> to vector<8x128xf32>
    %c0_5 = arith.constant 0 : index
    %4 = memref.load %arg2[%c0_5] : memref<30xf32, #tpu.memory_space<smem>>
    %c1 = arith.constant 1 : index
    %5 = memref.load %arg2[%c1] : memref<30xf32, #tpu.memory_space<smem>>
    %c2 = arith.constant 2 : index
    %6 = memref.load %arg2[%c2] : memref<30xf32, #tpu.memory_space<smem>>
    %c3 = arith.constant 3 : index
    %7 = memref.load %arg2[%c3] : memref<30xf32, #tpu.memory_space<smem>>
    %c4 = arith.constant 4 : index
    %8 = memref.load %arg2[%c4] : memref<30xf32, #tpu.memory_space<smem>>
    %c5 = arith.constant 5 : index
    %9 = memref.load %arg2[%c5] : memref<30xf32, #tpu.memory_space<smem>>
    %c6 = arith.constant 6 : index
    %10 = memref.load %arg2[%c6] : memref<30xf32, #tpu.memory_space<smem>>
    %c7 = arith.constant 7 : index
    %11 = memref.load %arg2[%c7] : memref<30xf32, #tpu.memory_space<smem>>
    %c8 = arith.constant 8 : index
    %12 = memref.load %arg2[%c8] : memref<30xf32, #tpu.memory_space<smem>>
    %cst = arith.constant 2.000000e+00 : f32
    %13 = arith.mulf %cst, %10 : f32
    %cst_6 = arith.constant 2.000000e+00 : f32
    %14 = arith.mulf %cst_6, %11 : f32
    %15 = vector.broadcast %6 : f32 to vector<8x128xf32>
    %16 = arith.subf %1, %15 : vector<8x128xf32>
    %17 = vector.broadcast %4 : f32 to vector<8x128xf32>
    %18 = arith.mulf %16, %17 : vector<8x128xf32>
    %19 = vector.broadcast %7 : f32 to vector<8x128xf32>
    %20 = arith.subf %3, %19 : vector<8x128xf32>
    %21 = vector.broadcast %5 : f32 to vector<8x128xf32>
    %22 = arith.mulf %20, %21 : vector<8x128xf32>
    %23 = arith.mulf %18, %18 : vector<8x128xf32>
    %24 = arith.mulf %22, %22 : vector<8x128xf32>
    %25 = arith.mulf %18, %22 : vector<8x128xf32>
    %26 = arith.addf %23, %24 : vector<8x128xf32>
    %27 = vector.broadcast %12 : f32 to vector<8x128xf32>
    %28 = arith.mulf %26, %27 : vector<8x128xf32>
    %29 = vector.broadcast %9 : f32 to vector<8x128xf32>
    %30 = arith.addf %29, %28 : vector<8x128xf32>
    %31 = arith.mulf %26, %30 : vector<8x128xf32>
    %32 = vector.broadcast %8 : f32 to vector<8x128xf32>
    %33 = arith.addf %32, %31 : vector<8x128xf32>
    %34 = arith.mulf %26, %33 : vector<8x128xf32>
    %cst_7 = arith.constant 1.000000e+00 : f32
    %35 = vector.broadcast %cst_7 : f32 to vector<8x128xf32>
    %36 = arith.addf %35, %34 : vector<8x128xf32>
    %37 = tpu.reciprocal %36 {approx = true} : vector<8x128xf32> -> vector<8x128xf32>
    %38 = arith.mulf %36, %37 : vector<8x128xf32>
    %cst_8 = arith.constant 2.000000e+00 : f32
    %39 = vector.broadcast %cst_8 : f32 to vector<8x128xf32>
    %40 = arith.subf %39, %38 : vector<8x128xf32>
    %41 = arith.mulf %37, %40 : vector<8x128xf32>
    %42 = vector.broadcast %13 : f32 to vector<8x128xf32>
    %43 = arith.mulf %42, %25 : vector<8x128xf32>
    %cst_9 = arith.constant 2.000000e+00 : f32
    %44 = vector.broadcast %cst_9 : f32 to vector<8x128xf32>
    %45 = arith.mulf %44, %23 : vector<8x128xf32>
    %46 = arith.addf %26, %45 : vector<8x128xf32>
    %47 = vector.broadcast %11 : f32 to vector<8x128xf32>
    %48 = arith.mulf %47, %46 : vector<8x128xf32>
    %49 = arith.addf %43, %48 : vector<8x128xf32>
    %cst_10 = arith.constant 2.000000e+00 : f32
    %50 = vector.broadcast %cst_10 : f32 to vector<8x128xf32>
    %51 = arith.mulf %50, %24 : vector<8x128xf32>
    %52 = arith.addf %26, %51 : vector<8x128xf32>
    %53 = vector.broadcast %10 : f32 to vector<8x128xf32>
    %54 = arith.mulf %53, %52 : vector<8x128xf32>
    %55 = vector.broadcast %14 : f32 to vector<8x128xf32>
    %56 = arith.mulf %55, %25 : vector<8x128xf32>
    %57 = arith.addf %54, %56 : vector<8x128xf32>
    %58 = arith.subf %18, %49 : vector<8x128xf32>
    %59 = arith.mulf %58, %41 : vector<8x128xf32>
    %60 = arith.subf %22, %57 : vector<8x128xf32>
    %61 = arith.mulf %60, %41 : vector<8x128xf32>
    %62 = arith.mulf %59, %59 : vector<8x128xf32>
    %63 = arith.mulf %61, %61 : vector<8x128xf32>
    %64 = arith.mulf %59, %61 : vector<8x128xf32>
    %65 = arith.addf %62, %63 : vector<8x128xf32>
    %66 = vector.broadcast %12 : f32 to vector<8x128xf32>
    %67 = arith.mulf %65, %66 : vector<8x128xf32>
    %68 = vector.broadcast %9 : f32 to vector<8x128xf32>
    %69 = arith.addf %68, %67 : vector<8x128xf32>
    %70 = arith.mulf %65, %69 : vector<8x128xf32>
    %71 = vector.broadcast %8 : f32 to vector<8x128xf32>
    %72 = arith.addf %71, %70 : vector<8x128xf32>
    %73 = arith.mulf %65, %72 : vector<8x128xf32>
    %cst_11 = arith.constant 1.000000e+00 : f32
    %74 = vector.broadcast %cst_11 : f32 to vector<8x128xf32>
    %75 = arith.addf %74, %73 : vector<8x128xf32>
    %76 = tpu.reciprocal %75 {approx = true} : vector<8x128xf32> -> vector<8x128xf32>
    %77 = arith.mulf %75, %76 : vector<8x128xf32>
    %cst_12 = arith.constant 2.000000e+00 : f32
    %78 = vector.broadcast %cst_12 : f32 to vector<8x128xf32>
    %79 = arith.subf %78, %77 : vector<8x128xf32>
    %80 = arith.mulf %76, %79 : vector<8x128xf32>
    %81 = vector.broadcast %13 : f32 to vector<8x128xf32>
    %82 = arith.mulf %81, %64 : vector<8x128xf32>
    %cst_13 = arith.constant 2.000000e+00 : f32
    %83 = vector.broadcast %cst_13 : f32 to vector<8x128xf32>
    %84 = arith.mulf %83, %62 : vector<8x128xf32>
    %85 = arith.addf %65, %84 : vector<8x128xf32>
    %86 = vector.broadcast %11 : f32 to vector<8x128xf32>
    %87 = arith.mulf %86, %85 : vector<8x128xf32>
    %88 = arith.addf %82, %87 : vector<8x128xf32>
    %cst_14 = arith.constant 2.000000e+00 : f32
    %89 = vector.broadcast %cst_14 : f32 to vector<8x128xf32>
    %90 = arith.mulf %89, %63 : vector<8x128xf32>
    %91 = arith.addf %65, %90 : vector<8x128xf32>
    %92 = vector.broadcast %10 : f32 to vector<8x128xf32>
    %93 = arith.mulf %92, %91 : vector<8x128xf32>
    %94 = vector.broadcast %14 : f32 to vector<8x128xf32>
    %95 = arith.mulf %94, %64 : vector<8x128xf32>
    %96 = arith.addf %93, %95 : vector<8x128xf32>
    %97 = arith.subf %18, %88 : vector<8x128xf32>
    %98 = arith.mulf %97, %80 : vector<8x128xf32>
    %99 = arith.subf %22, %96 : vector<8x128xf32>
    %100 = arith.mulf %99, %80 : vector<8x128xf32>
    %101 = arith.mulf %98, %98 : vector<8x128xf32>
    %102 = arith.mulf %100, %100 : vector<8x128xf32>
    %103 = arith.mulf %98, %100 : vector<8x128xf32>
    %104 = arith.addf %101, %102 : vector<8x128xf32>
    %105 = vector.broadcast %12 : f32 to vector<8x128xf32>
    %106 = arith.mulf %104, %105 : vector<8x128xf32>
    %107 = vector.broadcast %9 : f32 to vector<8x128xf32>
    %108 = arith.addf %107, %106 : vector<8x128xf32>
    %109 = arith.mulf %104, %108 : vector<8x128xf32>
    %110 = vector.broadcast %8 : f32 to vector<8x128xf32>
    %111 = arith.addf %110, %109 : vector<8x128xf32>
    %112 = arith.mulf %104, %111 : vector<8x128xf32>
    %cst_15 = arith.constant 1.000000e+00 : f32
    %113 = vector.broadcast %cst_15 : f32 to vector<8x128xf32>
    %114 = arith.addf %113, %112 : vector<8x128xf32>
    %115 = tpu.reciprocal %114 {approx = true} : vector<8x128xf32> -> vector<8x128xf32>
    %116 = arith.mulf %114, %115 : vector<8x128xf32>
    %cst_16 = arith.constant 2.000000e+00 : f32
    %117 = vector.broadcast %cst_16 : f32 to vector<8x128xf32>
    %118 = arith.subf %117, %116 : vector<8x128xf32>
    %119 = arith.mulf %115, %118 : vector<8x128xf32>
    %120 = vector.broadcast %13 : f32 to vector<8x128xf32>
    %121 = arith.mulf %120, %103 : vector<8x128xf32>
    %cst_17 = arith.constant 2.000000e+00 : f32
    %122 = vector.broadcast %cst_17 : f32 to vector<8x128xf32>
    %123 = arith.mulf %122, %101 : vector<8x128xf32>
    %124 = arith.addf %104, %123 : vector<8x128xf32>
    %125 = vector.broadcast %11 : f32 to vector<8x128xf32>
    %126 = arith.mulf %125, %124 : vector<8x128xf32>
    %127 = arith.addf %121, %126 : vector<8x128xf32>
    %cst_18 = arith.constant 2.000000e+00 : f32
    %128 = vector.broadcast %cst_18 : f32 to vector<8x128xf32>
    %129 = arith.mulf %128, %102 : vector<8x128xf32>
    %130 = arith.addf %104, %129 : vector<8x128xf32>
    %131 = vector.broadcast %10 : f32 to vector<8x128xf32>
    %132 = arith.mulf %131, %130 : vector<8x128xf32>
    %133 = vector.broadcast %14 : f32 to vector<8x128xf32>
    %134 = arith.mulf %133, %103 : vector<8x128xf32>
    %135 = arith.addf %132, %134 : vector<8x128xf32>
    %136 = arith.subf %18, %127 : vector<8x128xf32>
    %137 = arith.mulf %136, %119 : vector<8x128xf32>
    %138 = arith.subf %22, %135 : vector<8x128xf32>
    %139 = arith.mulf %138, %119 : vector<8x128xf32>
    %140 = arith.mulf %137, %137 : vector<8x128xf32>
    %141 = arith.mulf %139, %139 : vector<8x128xf32>
    %142 = arith.mulf %137, %139 : vector<8x128xf32>
    %143 = arith.addf %140, %141 : vector<8x128xf32>
    %144 = vector.broadcast %12 : f32 to vector<8x128xf32>
    %145 = arith.mulf %143, %144 : vector<8x128xf32>
    %146 = vector.broadcast %9 : f32 to vector<8x128xf32>
    %147 = arith.addf %146, %145 : vector<8x128xf32>
    %148 = arith.mulf %143, %147 : vector<8x128xf32>
    %149 = vector.broadcast %8 : f32 to vector<8x128xf32>
    %150 = arith.addf %149, %148 : vector<8x128xf32>
    %151 = arith.mulf %143, %150 : vector<8x128xf32>
    %cst_19 = arith.constant 1.000000e+00 : f32
    %152 = vector.broadcast %cst_19 : f32 to vector<8x128xf32>
    %153 = arith.addf %152, %151 : vector<8x128xf32>
    %154 = tpu.reciprocal %153 {approx = true} : vector<8x128xf32> -> vector<8x128xf32>
    %155 = arith.mulf %153, %154 : vector<8x128xf32>
    %cst_20 = arith.constant 2.000000e+00 : f32
    %156 = vector.broadcast %cst_20 : f32 to vector<8x128xf32>
    %157 = arith.subf %156, %155 : vector<8x128xf32>
    %158 = arith.mulf %154, %157 : vector<8x128xf32>
    %159 = vector.broadcast %13 : f32 to vector<8x128xf32>
    %160 = arith.mulf %159, %142 : vector<8x128xf32>
    %cst_21 = arith.constant 2.000000e+00 : f32
    %161 = vector.broadcast %cst_21 : f32 to vector<8x128xf32>
    %162 = arith.mulf %161, %140 : vector<8x128xf32>
    %163 = arith.addf %143, %162 : vector<8x128xf32>
    %164 = vector.broadcast %11 : f32 to vector<8x128xf32>
    %165 = arith.mulf %164, %163 : vector<8x128xf32>
    %166 = arith.addf %160, %165 : vector<8x128xf32>
    %cst_22 = arith.constant 2.000000e+00 : f32
    %167 = vector.broadcast %cst_22 : f32 to vector<8x128xf32>
    %168 = arith.mulf %167, %141 : vector<8x128xf32>
    %169 = arith.addf %143, %168 : vector<8x128xf32>
    %170 = vector.broadcast %10 : f32 to vector<8x128xf32>
    %171 = arith.mulf %170, %169 : vector<8x128xf32>
    %172 = vector.broadcast %14 : f32 to vector<8x128xf32>
    %173 = arith.mulf %172, %142 : vector<8x128xf32>
    %174 = arith.addf %171, %173 : vector<8x128xf32>
    %175 = arith.subf %18, %166 : vector<8x128xf32>
    %176 = arith.mulf %175, %158 : vector<8x128xf32>
    %177 = arith.subf %22, %174 : vector<8x128xf32>
    %178 = arith.mulf %177, %158 : vector<8x128xf32>
    %179 = arith.mulf %176, %176 : vector<8x128xf32>
    %180 = arith.mulf %178, %178 : vector<8x128xf32>
    %181 = arith.mulf %176, %178 : vector<8x128xf32>
    %182 = arith.addf %179, %180 : vector<8x128xf32>
    %183 = vector.broadcast %12 : f32 to vector<8x128xf32>
    %184 = arith.mulf %182, %183 : vector<8x128xf32>
    %185 = vector.broadcast %9 : f32 to vector<8x128xf32>
    %186 = arith.addf %185, %184 : vector<8x128xf32>
    %187 = arith.mulf %182, %186 : vector<8x128xf32>
    %188 = vector.broadcast %8 : f32 to vector<8x128xf32>
    %189 = arith.addf %188, %187 : vector<8x128xf32>
    %190 = arith.mulf %182, %189 : vector<8x128xf32>
    %cst_23 = arith.constant 1.000000e+00 : f32
    %191 = vector.broadcast %cst_23 : f32 to vector<8x128xf32>
    %192 = arith.addf %191, %190 : vector<8x128xf32>
    %193 = tpu.reciprocal %192 {approx = true} : vector<8x128xf32> -> vector<8x128xf32>
    %194 = arith.mulf %192, %193 : vector<8x128xf32>
    %cst_24 = arith.constant 2.000000e+00 : f32
    %195 = vector.broadcast %cst_24 : f32 to vector<8x128xf32>
    %196 = arith.subf %195, %194 : vector<8x128xf32>
    %197 = arith.mulf %193, %196 : vector<8x128xf32>
    %198 = vector.broadcast %13 : f32 to vector<8x128xf32>
    %199 = arith.mulf %198, %181 : vector<8x128xf32>
    %cst_25 = arith.constant 2.000000e+00 : f32
    %200 = vector.broadcast %cst_25 : f32 to vector<8x128xf32>
    %201 = arith.mulf %200, %179 : vector<8x128xf32>
    %202 = arith.addf %182, %201 : vector<8x128xf32>
    %203 = vector.broadcast %11 : f32 to vector<8x128xf32>
    %204 = arith.mulf %203, %202 : vector<8x128xf32>
    %205 = arith.addf %199, %204 : vector<8x128xf32>
    %cst_26 = arith.constant 2.000000e+00 : f32
    %206 = vector.broadcast %cst_26 : f32 to vector<8x128xf32>
    %207 = arith.mulf %206, %180 : vector<8x128xf32>
    %208 = arith.addf %182, %207 : vector<8x128xf32>
    %209 = vector.broadcast %10 : f32 to vector<8x128xf32>
    %210 = arith.mulf %209, %208 : vector<8x128xf32>
    %211 = vector.broadcast %14 : f32 to vector<8x128xf32>
    %212 = arith.mulf %211, %181 : vector<8x128xf32>
    %213 = arith.addf %210, %212 : vector<8x128xf32>
    %214 = arith.subf %18, %205 : vector<8x128xf32>
    %215 = arith.mulf %214, %197 : vector<8x128xf32>
    %216 = arith.subf %22, %213 : vector<8x128xf32>
    %217 = arith.mulf %216, %197 : vector<8x128xf32>
    %c0_27 = arith.constant 0 : index
    %c0_28 = arith.constant 0 : index
    %c0_29 = arith.constant 0 : index
    %218 = vector.load %arg5[%c0_27, %c0_28, %c0_29] : memref<1x8x128xf32, #tpu.memory_space<vmem>>, vector<1x8x128xf32>
    %219 = vector.shape_cast %218 : vector<1x8x128xf32> to vector<8x128xf32>
    %c0_30 = arith.constant 0 : index
    %c0_31 = arith.constant 0 : index
    %c0_32 = arith.constant 0 : index
    %220 = vector.load %arg6[%c0_30, %c0_31, %c0_32] : memref<1x8x128xf32, #tpu.memory_space<vmem>>, vector<1x8x128xf32>
    %221 = vector.shape_cast %220 : vector<1x8x128xf32> to vector<8x128xf32>
    %c9 = arith.constant 9 : index
    %222 = memref.load %arg2[%c9] : memref<30xf32, #tpu.memory_space<smem>>
    %c10 = arith.constant 10 : index
    %223 = memref.load %arg2[%c10] : memref<30xf32, #tpu.memory_space<smem>>
    %c11 = arith.constant 11 : index
    %224 = memref.load %arg2[%c11] : memref<30xf32, #tpu.memory_space<smem>>
    %c12 = arith.constant 12 : index
    %225 = memref.load %arg2[%c12] : memref<30xf32, #tpu.memory_space<smem>>
    %c13 = arith.constant 13 : index
    %226 = memref.load %arg2[%c13] : memref<30xf32, #tpu.memory_space<smem>>
    %c14 = arith.constant 14 : index
    %227 = memref.load %arg2[%c14] : memref<30xf32, #tpu.memory_space<smem>>
    %c15 = arith.constant 15 : index
    %228 = memref.load %arg2[%c15] : memref<30xf32, #tpu.memory_space<smem>>
    %c16 = arith.constant 16 : index
    %229 = memref.load %arg2[%c16] : memref<30xf32, #tpu.memory_space<smem>>
    %c17 = arith.constant 17 : index
    %230 = memref.load %arg2[%c17] : memref<30xf32, #tpu.memory_space<smem>>
    %cst_33 = arith.constant 2.000000e+00 : f32
    %231 = arith.mulf %cst_33, %228 : f32
    %cst_34 = arith.constant 2.000000e+00 : f32
    %232 = arith.mulf %cst_34, %229 : f32
    %233 = vector.broadcast %224 : f32 to vector<8x128xf32>
    %234 = arith.subf %219, %233 : vector<8x128xf32>
    %235 = vector.broadcast %222 : f32 to vector<8x128xf32>
    %236 = arith.mulf %234, %235 : vector<8x128xf32>
    %237 = vector.broadcast %225 : f32 to vector<8x128xf32>
    %238 = arith.subf %221, %237 : vector<8x128xf32>
    %239 = vector.broadcast %223 : f32 to vector<8x128xf32>
    %240 = arith.mulf %238, %239 : vector<8x128xf32>
    %241 = arith.mulf %236, %236 : vector<8x128xf32>
    %242 = arith.mulf %240, %240 : vector<8x128xf32>
    %243 = arith.mulf %236, %240 : vector<8x128xf32>
    %244 = arith.addf %241, %242 : vector<8x128xf32>
    %245 = vector.broadcast %230 : f32 to vector<8x128xf32>
    %246 = arith.mulf %244, %245 : vector<8x128xf32>
    %247 = vector.broadcast %227 : f32 to vector<8x128xf32>
    %248 = arith.addf %247, %246 : vector<8x128xf32>
    %249 = arith.mulf %244, %248 : vector<8x128xf32>
    %250 = vector.broadcast %226 : f32 to vector<8x128xf32>
    %251 = arith.addf %250, %249 : vector<8x128xf32>
    %252 = arith.mulf %244, %251 : vector<8x128xf32>
    %cst_35 = arith.constant 1.000000e+00 : f32
    %253 = vector.broadcast %cst_35 : f32 to vector<8x128xf32>
    %254 = arith.addf %253, %252 : vector<8x128xf32>
    %255 = tpu.reciprocal %254 {approx = true} : vector<8x128xf32> -> vector<8x128xf32>
    %256 = arith.mulf %254, %255 : vector<8x128xf32>
    %cst_36 = arith.constant 2.000000e+00 : f32
    %257 = vector.broadcast %cst_36 : f32 to vector<8x128xf32>
    %258 = arith.subf %257, %256 : vector<8x128xf32>
    %259 = arith.mulf %255, %258 : vector<8x128xf32>
    %260 = vector.broadcast %231 : f32 to vector<8x128xf32>
    %261 = arith.mulf %260, %243 : vector<8x128xf32>
    %cst_37 = arith.constant 2.000000e+00 : f32
    %262 = vector.broadcast %cst_37 : f32 to vector<8x128xf32>
    %263 = arith.mulf %262, %241 : vector<8x128xf32>
    %264 = arith.addf %244, %263 : vector<8x128xf32>
    %265 = vector.broadcast %229 : f32 to vector<8x128xf32>
    %266 = arith.mulf %265, %264 : vector<8x128xf32>
    %267 = arith.addf %261, %266 : vector<8x128xf32>
    %cst_38 = arith.constant 2.000000e+00 : f32
    %268 = vector.broadcast %cst_38 : f32 to vector<8x128xf32>
    %269 = arith.mulf %268, %242 : vector<8x128xf32>
    %270 = arith.addf %244, %269 : vector<8x128xf32>
    %271 = vector.broadcast %228 : f32 to vector<8x128xf32>
    %272 = arith.mulf %271, %270 : vector<8x128xf32>
    %273 = vector.broadcast %232 : f32 to vector<8x128xf32>
    %274 = arith.mulf %273, %243 : vector<8x128xf32>
    %275 = arith.addf %272, %274 : vector<8x128xf32>
    %276 = arith.subf %236, %267 : vector<8x128xf32>
    %277 = arith.mulf %276, %259 : vector<8x128xf32>
    %278 = arith.subf %240, %275 : vector<8x128xf32>
    %279 = arith.mulf %278, %259 : vector<8x128xf32>
    %280 = arith.mulf %277, %277 : vector<8x128xf32>
    %281 = arith.mulf %279, %279 : vector<8x128xf32>
    %282 = arith.mulf %277, %279 : vector<8x128xf32>
    %283 = arith.addf %280, %281 : vector<8x128xf32>
    %284 = vector.broadcast %230 : f32 to vector<8x128xf32>
    %285 = arith.mulf %283, %284 : vector<8x128xf32>
    %286 = vector.broadcast %227 : f32 to vector<8x128xf32>
    %287 = arith.addf %286, %285 : vector<8x128xf32>
    %288 = arith.mulf %283, %287 : vector<8x128xf32>
    %289 = vector.broadcast %226 : f32 to vector<8x128xf32>
    %290 = arith.addf %289, %288 : vector<8x128xf32>
    %291 = arith.mulf %283, %290 : vector<8x128xf32>
    %cst_39 = arith.constant 1.000000e+00 : f32
    %292 = vector.broadcast %cst_39 : f32 to vector<8x128xf32>
    %293 = arith.addf %292, %291 : vector<8x128xf32>
    %294 = tpu.reciprocal %293 {approx = true} : vector<8x128xf32> -> vector<8x128xf32>
    %295 = arith.mulf %293, %294 : vector<8x128xf32>
    %cst_40 = arith.constant 2.000000e+00 : f32
    %296 = vector.broadcast %cst_40 : f32 to vector<8x128xf32>
    %297 = arith.subf %296, %295 : vector<8x128xf32>
    %298 = arith.mulf %294, %297 : vector<8x128xf32>
    %299 = vector.broadcast %231 : f32 to vector<8x128xf32>
    %300 = arith.mulf %299, %282 : vector<8x128xf32>
    %cst_41 = arith.constant 2.000000e+00 : f32
    %301 = vector.broadcast %cst_41 : f32 to vector<8x128xf32>
    %302 = arith.mulf %301, %280 : vector<8x128xf32>
    %303 = arith.addf %283, %302 : vector<8x128xf32>
    %304 = vector.broadcast %229 : f32 to vector<8x128xf32>
    %305 = arith.mulf %304, %303 : vector<8x128xf32>
    %306 = arith.addf %300, %305 : vector<8x128xf32>
    %cst_42 = arith.constant 2.000000e+00 : f32
    %307 = vector.broadcast %cst_42 : f32 to vector<8x128xf32>
    %308 = arith.mulf %307, %281 : vector<8x128xf32>
    %309 = arith.addf %283, %308 : vector<8x128xf32>
    %310 = vector.broadcast %228 : f32 to vector<8x128xf32>
    %311 = arith.mulf %310, %309 : vector<8x128xf32>
    %312 = vector.broadcast %232 : f32 to vector<8x128xf32>
    %313 = arith.mulf %312, %282 : vector<8x128xf32>
    %314 = arith.addf %311, %313 : vector<8x128xf32>
    %315 = arith.subf %236, %306 : vector<8x128xf32>
    %316 = arith.mulf %315, %298 : vector<8x128xf32>
    %317 = arith.subf %240, %314 : vector<8x128xf32>
    %318 = arith.mulf %317, %298 : vector<8x128xf32>
    %319 = arith.mulf %316, %316 : vector<8x128xf32>
    %320 = arith.mulf %318, %318 : vector<8x128xf32>
    %321 = arith.mulf %316, %318 : vector<8x128xf32>
    %322 = arith.addf %319, %320 : vector<8x128xf32>
    %323 = vector.broadcast %230 : f32 to vector<8x128xf32>
    %324 = arith.mulf %322, %323 : vector<8x128xf32>
    %325 = vector.broadcast %227 : f32 to vector<8x128xf32>
    %326 = arith.addf %325, %324 : vector<8x128xf32>
    %327 = arith.mulf %322, %326 : vector<8x128xf32>
    %328 = vector.broadcast %226 : f32 to vector<8x128xf32>
    %329 = arith.addf %328, %327 : vector<8x128xf32>
    %330 = arith.mulf %322, %329 : vector<8x128xf32>
    %cst_43 = arith.constant 1.000000e+00 : f32
    %331 = vector.broadcast %cst_43 : f32 to vector<8x128xf32>
    %332 = arith.addf %331, %330 : vector<8x128xf32>
    %333 = tpu.reciprocal %332 {approx = true} : vector<8x128xf32> -> vector<8x128xf32>
    %334 = arith.mulf %332, %333 : vector<8x128xf32>
    %cst_44 = arith.constant 2.000000e+00 : f32
    %335 = vector.broadcast %cst_44 : f32 to vector<8x128xf32>
    %336 = arith.subf %335, %334 : vector<8x128xf32>
    %337 = arith.mulf %333, %336 : vector<8x128xf32>
    %338 = vector.broadcast %231 : f32 to vector<8x128xf32>
    %339 = arith.mulf %338, %321 : vector<8x128xf32>
    %cst_45 = arith.constant 2.000000e+00 : f32
    %340 = vector.broadcast %cst_45 : f32 to vector<8x128xf32>
    %341 = arith.mulf %340, %319 : vector<8x128xf32>
    %342 = arith.addf %322, %341 : vector<8x128xf32>
    %343 = vector.broadcast %229 : f32 to vector<8x128xf32>
    %344 = arith.mulf %343, %342 : vector<8x128xf32>
    %345 = arith.addf %339, %344 : vector<8x128xf32>
    %cst_46 = arith.constant 2.000000e+00 : f32
    %346 = vector.broadcast %cst_46 : f32 to vector<8x128xf32>
    %347 = arith.mulf %346, %320 : vector<8x128xf32>
    %348 = arith.addf %322, %347 : vector<8x128xf32>
    %349 = vector.broadcast %228 : f32 to vector<8x128xf32>
    %350 = arith.mulf %349, %348 : vector<8x128xf32>
    %351 = vector.broadcast %232 : f32 to vector<8x128xf32>
    %352 = arith.mulf %351, %321 : vector<8x128xf32>
    %353 = arith.addf %350, %352 : vector<8x128xf32>
    %354 = arith.subf %236, %345 : vector<8x128xf32>
    %355 = arith.mulf %354, %337 : vector<8x128xf32>
    %356 = arith.subf %240, %353 : vector<8x128xf32>
    %357 = arith.mulf %356, %337 : vector<8x128xf32>
    %358 = arith.mulf %355, %355 : vector<8x128xf32>
    %359 = arith.mulf %357, %357 : vector<8x128xf32>
    %360 = arith.mulf %355, %357 : vector<8x128xf32>
    %361 = arith.addf %358, %359 : vector<8x128xf32>
    %362 = vector.broadcast %230 : f32 to vector<8x128xf32>
    %363 = arith.mulf %361, %362 : vector<8x128xf32>
    %364 = vector.broadcast %227 : f32 to vector<8x128xf32>
    %365 = arith.addf %364, %363 : vector<8x128xf32>
    %366 = arith.mulf %361, %365 : vector<8x128xf32>
    %367 = vector.broadcast %226 : f32 to vector<8x128xf32>
    %368 = arith.addf %367, %366 : vector<8x128xf32>
    %369 = arith.mulf %361, %368 : vector<8x128xf32>
    %cst_47 = arith.constant 1.000000e+00 : f32
    %370 = vector.broadcast %cst_47 : f32 to vector<8x128xf32>
    %371 = arith.addf %370, %369 : vector<8x128xf32>
    %372 = tpu.reciprocal %371 {approx = true} : vector<8x128xf32> -> vector<8x128xf32>
    %373 = arith.mulf %371, %372 : vector<8x128xf32>
    %cst_48 = arith.constant 2.000000e+00 : f32
    %374 = vector.broadcast %cst_48 : f32 to vector<8x128xf32>
    %375 = arith.subf %374, %373 : vector<8x128xf32>
    %376 = arith.mulf %372, %375 : vector<8x128xf32>
    %377 = vector.broadcast %231 : f32 to vector<8x128xf32>
    %378 = arith.mulf %377, %360 : vector<8x128xf32>
    %cst_49 = arith.constant 2.000000e+00 : f32
    %379 = vector.broadcast %cst_49 : f32 to vector<8x128xf32>
    %380 = arith.mulf %379, %358 : vector<8x128xf32>
    %381 = arith.addf %361, %380 : vector<8x128xf32>
    %382 = vector.broadcast %229 : f32 to vector<8x128xf32>
    %383 = arith.mulf %382, %381 : vector<8x128xf32>
    %384 = arith.addf %378, %383 : vector<8x128xf32>
    %cst_50 = arith.constant 2.000000e+00 : f32
    %385 = vector.broadcast %cst_50 : f32 to vector<8x128xf32>
    %386 = arith.mulf %385, %359 : vector<8x128xf32>
    %387 = arith.addf %361, %386 : vector<8x128xf32>
    %388 = vector.broadcast %228 : f32 to vector<8x128xf32>
    %389 = arith.mulf %388, %387 : vector<8x128xf32>
    %390 = vector.broadcast %232 : f32 to vector<8x128xf32>
    %391 = arith.mulf %390, %360 : vector<8x128xf32>
    %392 = arith.addf %389, %391 : vector<8x128xf32>
    %393 = arith.subf %236, %384 : vector<8x128xf32>
    %394 = arith.mulf %393, %376 : vector<8x128xf32>
    %395 = arith.subf %240, %392 : vector<8x128xf32>
    %396 = arith.mulf %395, %376 : vector<8x128xf32>
    %397 = arith.mulf %394, %394 : vector<8x128xf32>
    %398 = arith.mulf %396, %396 : vector<8x128xf32>
    %399 = arith.mulf %394, %396 : vector<8x128xf32>
    %400 = arith.addf %397, %398 : vector<8x128xf32>
    %401 = vector.broadcast %230 : f32 to vector<8x128xf32>
    %402 = arith.mulf %400, %401 : vector<8x128xf32>
    %403 = vector.broadcast %227 : f32 to vector<8x128xf32>
    %404 = arith.addf %403, %402 : vector<8x128xf32>
    %405 = arith.mulf %400, %404 : vector<8x128xf32>
    %406 = vector.broadcast %226 : f32 to vector<8x128xf32>
    %407 = arith.addf %406, %405 : vector<8x128xf32>
    %408 = arith.mulf %400, %407 : vector<8x128xf32>
    %cst_51 = arith.constant 1.000000e+00 : f32
    %409 = vector.broadcast %cst_51 : f32 to vector<8x128xf32>
    %410 = arith.addf %409, %408 : vector<8x128xf32>
    %411 = tpu.reciprocal %410 {approx = true} : vector<8x128xf32> -> vector<8x128xf32>
    %412 = arith.mulf %410, %411 : vector<8x128xf32>
    %cst_52 = arith.constant 2.000000e+00 : f32
    %413 = vector.broadcast %cst_52 : f32 to vector<8x128xf32>
    %414 = arith.subf %413, %412 : vector<8x128xf32>
    %415 = arith.mulf %411, %414 : vector<8x128xf32>
    %416 = vector.broadcast %231 : f32 to vector<8x128xf32>
    %417 = arith.mulf %416, %399 : vector<8x128xf32>
    %cst_53 = arith.constant 2.000000e+00 : f32
    %418 = vector.broadcast %cst_53 : f32 to vector<8x128xf32>
    %419 = arith.mulf %418, %397 : vector<8x128xf32>
    %420 = arith.addf %400, %419 : vector<8x128xf32>
    %421 = vector.broadcast %229 : f32 to vector<8x128xf32>
    %422 = arith.mulf %421, %420 : vector<8x128xf32>
    %423 = arith.addf %417, %422 : vector<8x128xf32>
    %cst_54 = arith.constant 2.000000e+00 : f32
    %424 = vector.broadcast %cst_54 : f32 to vector<8x128xf32>
    %425 = arith.mulf %424, %398 : vector<8x128xf32>
    %426 = arith.addf %400, %425 : vector<8x128xf32>
    %427 = vector.broadcast %228 : f32 to vector<8x128xf32>
    %428 = arith.mulf %427, %426 : vector<8x128xf32>
    %429 = vector.broadcast %232 : f32 to vector<8x128xf32>
    %430 = arith.mulf %429, %399 : vector<8x128xf32>
    %431 = arith.addf %428, %430 : vector<8x128xf32>
    %432 = arith.subf %236, %423 : vector<8x128xf32>
    %433 = arith.mulf %432, %415 : vector<8x128xf32>
    %434 = arith.subf %240, %431 : vector<8x128xf32>
    %435 = arith.mulf %434, %415 : vector<8x128xf32>
    %c18 = arith.constant 18 : index
    %436 = memref.load %arg2[%c18] : memref<30xf32, #tpu.memory_space<smem>>
    %c19 = arith.constant 19 : index
    %437 = memref.load %arg2[%c19] : memref<30xf32, #tpu.memory_space<smem>>
    %c20 = arith.constant 20 : index
    %438 = memref.load %arg2[%c20] : memref<30xf32, #tpu.memory_space<smem>>
    %c21 = arith.constant 21 : index
    %439 = memref.load %arg2[%c21] : memref<30xf32, #tpu.memory_space<smem>>
    %c22 = arith.constant 22 : index
    %440 = memref.load %arg2[%c22] : memref<30xf32, #tpu.memory_space<smem>>
    %c23 = arith.constant 23 : index
    %441 = memref.load %arg2[%c23] : memref<30xf32, #tpu.memory_space<smem>>
    %c24 = arith.constant 24 : index
    %442 = memref.load %arg2[%c24] : memref<30xf32, #tpu.memory_space<smem>>
    %c25 = arith.constant 25 : index
    %443 = memref.load %arg2[%c25] : memref<30xf32, #tpu.memory_space<smem>>
    %c26 = arith.constant 26 : index
    %444 = memref.load %arg2[%c26] : memref<30xf32, #tpu.memory_space<smem>>
    %c27 = arith.constant 27 : index
    %445 = memref.load %arg2[%c27] : memref<30xf32, #tpu.memory_space<smem>>
    %c28 = arith.constant 28 : index
    %446 = memref.load %arg2[%c28] : memref<30xf32, #tpu.memory_space<smem>>
    %c29 = arith.constant 29 : index
    %447 = memref.load %arg2[%c29] : memref<30xf32, #tpu.memory_space<smem>>
    %448 = vector.broadcast %436 : f32 to vector<8x128xf32>
    %449 = arith.mulf %448, %215 : vector<8x128xf32>
    %450 = vector.broadcast %437 : f32 to vector<8x128xf32>
    %451 = arith.mulf %450, %217 : vector<8x128xf32>
    %452 = arith.addf %449, %451 : vector<8x128xf32>
    %453 = vector.broadcast %438 : f32 to vector<8x128xf32>
    %454 = arith.addf %452, %453 : vector<8x128xf32>
    %455 = vector.broadcast %439 : f32 to vector<8x128xf32>
    %456 = arith.mulf %455, %215 : vector<8x128xf32>
    %457 = vector.broadcast %440 : f32 to vector<8x128xf32>
    %458 = arith.mulf %457, %217 : vector<8x128xf32>
    %459 = arith.addf %456, %458 : vector<8x128xf32>
    %460 = vector.broadcast %441 : f32 to vector<8x128xf32>
    %461 = arith.addf %459, %460 : vector<8x128xf32>
    %462 = vector.broadcast %442 : f32 to vector<8x128xf32>
    %463 = arith.mulf %462, %215 : vector<8x128xf32>
    %464 = vector.broadcast %443 : f32 to vector<8x128xf32>
    %465 = arith.mulf %464, %217 : vector<8x128xf32>
    %466 = arith.addf %463, %465 : vector<8x128xf32>
    %467 = vector.broadcast %444 : f32 to vector<8x128xf32>
    %468 = arith.addf %466, %467 : vector<8x128xf32>
    %469 = arith.mulf %454, %454 : vector<8x128xf32>
    %470 = arith.mulf %461, %461 : vector<8x128xf32>
    %471 = arith.addf %469, %470 : vector<8x128xf32>
    %472 = arith.mulf %468, %468 : vector<8x128xf32>
    %473 = arith.addf %471, %472 : vector<8x128xf32>
    %474 = arith.mulf %433, %433 : vector<8x128xf32>
    %475 = arith.mulf %435, %435 : vector<8x128xf32>
    %476 = arith.addf %474, %475 : vector<8x128xf32>
    %cst_55 = arith.constant 1.000000e+00 : f32
    %477 = vector.broadcast %cst_55 : f32 to vector<8x128xf32>
    %478 = arith.addf %476, %477 : vector<8x128xf32>
    %479 = arith.mulf %454, %433 : vector<8x128xf32>
    %480 = arith.mulf %461, %435 : vector<8x128xf32>
    %481 = arith.addf %479, %480 : vector<8x128xf32>
    %482 = arith.addf %481, %468 : vector<8x128xf32>
    %483 = vector.broadcast %445 : f32 to vector<8x128xf32>
    %484 = arith.mulf %454, %483 : vector<8x128xf32>
    %485 = vector.broadcast %446 : f32 to vector<8x128xf32>
    %486 = arith.mulf %461, %485 : vector<8x128xf32>
    %487 = arith.addf %484, %486 : vector<8x128xf32>
    %488 = vector.broadcast %447 : f32 to vector<8x128xf32>
    %489 = arith.mulf %468, %488 : vector<8x128xf32>
    %490 = arith.addf %487, %489 : vector<8x128xf32>
    %cst_56 = arith.constant 0.000000e+00 : f32
    %491 = vector.broadcast %cst_56 : f32 to vector<8x128xf32>
    %492 = arith.subf %491, %490 : vector<8x128xf32>
    %493 = vector.broadcast %445 : f32 to vector<8x128xf32>
    %494 = arith.mulf %433, %493 : vector<8x128xf32>
    %495 = vector.broadcast %446 : f32 to vector<8x128xf32>
    %496 = arith.mulf %435, %495 : vector<8x128xf32>
    %497 = arith.addf %494, %496 : vector<8x128xf32>
    %498 = vector.broadcast %447 : f32 to vector<8x128xf32>
    %499 = arith.addf %497, %498 : vector<8x128xf32>
    %500 = arith.mulf %473, %478 : vector<8x128xf32>
    %501 = arith.mulf %482, %482 : vector<8x128xf32>
    %502 = arith.subf %500, %501 : vector<8x128xf32>
    %503 = tpu.reciprocal %502 {approx = true} : vector<8x128xf32> -> vector<8x128xf32>
    %504 = arith.mulf %502, %503 : vector<8x128xf32>
    %cst_57 = arith.constant 2.000000e+00 : f32
    %505 = vector.broadcast %cst_57 : f32 to vector<8x128xf32>
    %506 = arith.subf %505, %504 : vector<8x128xf32>
    %507 = arith.mulf %503, %506 : vector<8x128xf32>
    %508 = arith.mulf %478, %492 : vector<8x128xf32>
    %509 = arith.mulf %482, %499 : vector<8x128xf32>
    %510 = arith.addf %508, %509 : vector<8x128xf32>
    %511 = arith.mulf %510, %507 : vector<8x128xf32>
    %512 = arith.mulf %482, %492 : vector<8x128xf32>
    %513 = arith.mulf %473, %499 : vector<8x128xf32>
    %514 = arith.addf %512, %513 : vector<8x128xf32>
    %515 = arith.mulf %514, %507 : vector<8x128xf32>
    %516 = arith.mulf %511, %215 : vector<8x128xf32>
    %c0_58 = arith.constant 0 : index
    %c0_59 = arith.constant 0 : index
    %c0_60 = arith.constant 0 : index
    %517 = vector.load %arg7[%c0_58, %c0_59, %c0_60] : memref<1x8x128xf32, #tpu.memory_space<vmem>>, vector<1x8x128xf32>
    %518 = vector.shape_cast %517 : vector<1x8x128xf32> to vector<8x128xf32>
    %519 = vector.shape_cast %516 : vector<8x128xf32> to vector<1x8x128xf32>
    tpu.vector_store %arg7[%c0_58, %c0_59, %c0_60], %519 {strides = array<i32>} : memref<1x8x128xf32, #tpu.memory_space<vmem>>, vector<1x8x128xf32>,
    %520 = arith.mulf %511, %217 : vector<8x128xf32>
    %c0_61 = arith.constant 0 : index
    %c0_62 = arith.constant 0 : index
    %c0_63 = arith.constant 0 : index
    %521 = vector.load %arg8[%c0_61, %c0_62, %c0_63] : memref<1x8x128xf32, #tpu.memory_space<vmem>>, vector<1x8x128xf32>
    %522 = vector.shape_cast %521 : vector<1x8x128xf32> to vector<8x128xf32>
    %523 = vector.shape_cast %520 : vector<8x128xf32> to vector<1x8x128xf32>
    tpu.vector_store %arg8[%c0_61, %c0_62, %c0_63], %523 {strides = array<i32>} : memref<1x8x128xf32, #tpu.memory_space<vmem>>, vector<1x8x128xf32>,
    %c0_64 = arith.constant 0 : index
    %c0_65 = arith.constant 0 : index
    %c0_66 = arith.constant 0 : index
    %524 = vector.load %arg9[%c0_64, %c0_65, %c0_66] : memref<1x8x128xf32, #tpu.memory_space<vmem>>, vector<1x8x128xf32>
    %525 = vector.shape_cast %524 : vector<1x8x128xf32> to vector<8x128xf32>
    %526 = vector.shape_cast %511 : vector<8x128xf32> to vector<1x8x128xf32>
    tpu.vector_store %arg9[%c0_64, %c0_65, %c0_66], %526 {strides = array<i32>} : memref<1x8x128xf32, #tpu.memory_space<vmem>>, vector<1x8x128xf32>,
    %527 = arith.mulf %511, %454 : vector<8x128xf32>
    %528 = vector.broadcast %445 : f32 to vector<8x128xf32>
    %529 = arith.addf %527, %528 : vector<8x128xf32>
    %530 = arith.mulf %515, %433 : vector<8x128xf32>
    %531 = arith.subf %529, %530 : vector<8x128xf32>
    %532 = arith.mulf %511, %461 : vector<8x128xf32>
    %533 = vector.broadcast %446 : f32 to vector<8x128xf32>
    %534 = arith.addf %532, %533 : vector<8x128xf32>
    %535 = arith.mulf %515, %435 : vector<8x128xf32>
    %536 = arith.subf %534, %535 : vector<8x128xf32>
    %537 = arith.mulf %511, %468 : vector<8x128xf32>
    %538 = vector.broadcast %447 : f32 to vector<8x128xf32>
    %539 = arith.addf %537, %538 : vector<8x128xf32>
    %540 = arith.subf %539, %515 : vector<8x128xf32>
    %541 = arith.mulf %531, %531 : vector<8x128xf32>
    %542 = arith.mulf %536, %536 : vector<8x128xf32>
    %543 = arith.addf %541, %542 : vector<8x128xf32>
    %544 = arith.mulf %540, %540 : vector<8x128xf32>
    %545 = arith.addf %543, %544 : vector<8x128xf32>
    %546 = math.sqrt %545 : vector<8x128xf32>
    %c0_67 = arith.constant 0 : index
    %c0_68 = arith.constant 0 : index
    %c0_69 = arith.constant 0 : index
    %547 = vector.load %arg10[%c0_67, %c0_68, %c0_69] : memref<1x8x128xf32, #tpu.memory_space<vmem>>, vector<1x8x128xf32>
    %548 = vector.shape_cast %547 : vector<1x8x128xf32> to vector<8x128xf32>
    %549 = vector.shape_cast %546 : vector<8x128xf32> to vector<1x8x128xf32>
    tpu.vector_store %arg10[%c0_67, %c0_68, %c0_69], %549 {strides = array<i32>} : memref<1x8x128xf32, #tpu.memory_space<vmem>>, vector<1x8x128xf32>,
    return
  }
  func.func @transform_0(%arg0: i32, %arg1: i32) -> i32 {
    %c0_i32 = arith.constant 0 : i32
    %c0_i32_0 = arith.constant 0 : i32
    return %c0_i32 : i32
  }
  func.func @transform_1(%arg0: i32, %arg1: i32) -> (i32, i32, i32) {
    %c0_i32 = arith.constant 0 : i32
    %c0_i32_0 = arith.constant 0 : i32
    return %arg0, %arg1, %c0_i32 : i32, i32, i32
  }
  func.func @transform_2(%arg0: i32, %arg1: i32) -> (i32, i32, i32) {
    %c0_i32 = arith.constant 0 : i32
    %c0_i32_0 = arith.constant 0 : i32
    return %arg0, %arg1, %c0_i32 : i32, i32, i32
  }
  func.func @transform_3(%arg0: i32, %arg1: i32) -> (i32, i32, i32) {
    %c0_i32 = arith.constant 0 : i32
    %c0_i32_0 = arith.constant 0 : i32
    return %arg0, %arg1, %c0_i32 : i32, i32, i32
  }
  func.func @transform_4(%arg0: i32, %arg1: i32) -> (i32, i32, i32) {
    %c0_i32 = arith.constant 0 : i32
    %c0_i32_0 = arith.constant 0 : i32
    return %arg0, %arg1, %c0_i32 : i32, i32, i32
  }
  func.func @transform_5(%arg0: i32, %arg1: i32) -> (i32, i32, i32) {
    %c0_i32 = arith.constant 0 : i32
    %c0_i32_0 = arith.constant 0 : i32
    return %arg0, %arg1, %c0_i32 : i32, i32, i32
  }
  func.func @transform_6(%arg0: i32, %arg1: i32) -> (i32, i32, i32) {
    %c0_i32 = arith.constant 0 : i32
    %c0_i32_0 = arith.constant 0 : i32
    return %arg0, %arg1, %c0_i32 : i32, i32, i32
  }
  func.func @transform_7(%arg0: i32, %arg1: i32) -> (i32, i32, i32) {
    %c0_i32 = arith.constant 0 : i32
    %c0_i32_0 = arith.constant 0 : i32
    return %arg0, %arg1, %c0_i32 : i32, i32, i32
  }
  func.func @transform_8(%arg0: i32, %arg1: i32) -> (i32, i32, i32) {
    %c0_i32 = arith.constant 0 : i32
    %c0_i32_0 = arith.constant 0 : i32
    return %arg0, %arg1, %c0_i32 : i32, i32, i32
  }
}

</mosaic_0001>

<bundles_post_ra>
// kernel: tpu_custom_call.1
= control target key start
LH: loop header
LB: loop body
LE: loop exit
PB: predicated region body
PF: predicated region fallthrough
CT: control target
= control target key end

     0   :  { %s2365_s0 = inlined_call_operand.hbm [shape: f32[30], index: 0, kind: input, shape index: {}]   ;;  %s2366_s1 = inlined_call_operand.hbm [shape: f32[2,8,128], index: 1, kind: input, shape index: {}]   ;;  %s2367_s2 = inlined_call_operand.hbm [shape: f32[2,8,128], index: 2, kind: input, shape index: {}]   ;;  %s2368_s3 = inlined_call_operand.hbm [shape: f32[2,8,128], index: 3, kind: input, shape index: {}]   ;;  %s2369_s4 = inlined_call_operand.hbm [shape: f32[2,8,128], index: 4, kind: input, shape index: {}]   ;;  %s2370_s5 = inlined_call_operand.hbm [shape: f32[2,8,128], index: 5, kind: output, shape index: {0}]   ;;  %s2371_s6 = inlined_call_operand.hbm [shape: f32[2,8,128], index: 6, kind: output, shape index: {1}]   ;;  %s2372_s7 = inlined_call_operand.hbm [shape: f32[2,8,128], index: 7, kind: output, shape index: {2}]   ;;  %s2373_s8 = inlined_call_operand.hbm [shape: f32[2,8,128], index: 8, kind: output, shape index: {3}]  }
   0x1   :  { %2383 = sst [smem:[#allocation32_spill]] %s2366_s1 }
   0x2   :  { %2384 = sst [smem:[#allocation33_spill]] %s2367_s2 }
   0x3   :  { %14 = vsyncpa [#allocation5], 0 }
   0x4   :  { %15 = vsyncpa [#allocation3], 0 }
   0x5   :  { %17 = vsyncpa [#allocation3 + $0x1], 0 }
   0x6   :  { %18 = vsyncpa [#allocation8], 0 }
   0x7   :  { %20 = vsyncpa [#allocation8 + $0x1], 0 }
   0x8   :  { %21 = vsyncpa [#allocation11], 0 }
   0x9   :  { %23 = vsyncpa [#allocation11 + $0x1], 0 }
   0xa   :  { %24 = vsyncpa [#allocation4], 0 }
   0xb   :  { %26 = vsyncpa [#allocation4 + $0x1], 0 }
   0xc   :  { %27 = vsyncpa [#allocation14], 0 }
   0xd   :  { %29 = vsyncpa [#allocation14 + $0x1], 0 }
   0xe   :  { %30 = vsyncpa [#allocation17], 0 }
   0xf   :  { %32 = vsyncpa [#allocation17 + $0x1], 0  ;;  %s1815_s27 = smov 0   ;;  %s1817_s28 = smov 0  }
  0x10   :  { %s1819_s29 = smov 0   ;;  %s1821_s30 = smov 0  }
  0x11   :  { %s1823_s9 = smov 0   ;;  %s1825_s10 = smov 0  }
  0x12 LB: > { %2385 = sst [smem:[#allocation25_spill]] %s1739_s27  ;;  %s50_s11 = sadd.s32 1, %s1755_s9  ;;  %s1759_s10 = sphi %s1825_s10, %s38_s10   ;;  %s1755_s9 = sphi %s1823_s9, %s2411_s9   ;;  %s1751_s30 = sphi %s1821_s30, %s2410_s30   ;;  %s1747_s29 = sphi %s1819_s29, %s2409_s29   ;;  %s1743_s28 = sphi %s1817_s28, %s2413_s28   ;;  %s1739_s27 = sphi %s1815_s27, %s2412_s27  }
  0x13   : > { %2386 = sst [smem:[#allocation26_spill]] %s1747_s29  ;;  %s80_s12 = sadd.s32 1, %s1747_s29 }
  0x14   : > { %2387 = sst [smem:[#allocation27_spill]] %s1755_s9  ;;  %p52_p0 = scmp.ge.s32.totalorder %s50_s11, 2 }
  0x15   : > { %2388 = sst [smem:[#allocation28_spill]] %s1759_s10  ;;  %p87_p1 = scmp.ne.s32.totalorder %s1747_s29, %s1743_s28 }
  0x16   : > { %p88_p2 = scmp.eq.s32.totalorder %s1759_s10, 0  ;;  %s2415_s11 = smov (%p52_p0, %s50_s11), 0 }
  0x17   : > { %2389 = sst [smem:[#allocation29_spill]] %s2415_s11  ;;  %p1382_p5 = scmp.lt.s32.totalorder %s1759_s10, 2 }
  0x18   : > { %p89_p4 = por %p88_p2, %p87_p1  ;;  %s75_s13 = ssub.s32 %s1755_s9, %s2415_s11 }
  0x19   : > { %s1860_s14 = sand.u32 1, %s1747_s29   ;;  %p78_p6 = scmp.eq.s32.totalorder %s75_s13, 0 }
  0x1a   : > { %s1863_s15 = sshll.u32 %s1860_s14, 3  ;;  %s1866_s16 = sshll.u32 %s1755_s9, 7 }
  0x1b   : > { %p1868_p7 = pnand %p1382_p5, %p89_p4  ;;  %s341_s19 = sand.u32 1, %s1759_s10  }
  0x1c   : > { %s1873_s18 = scalar_select %p78_p6, %s1747_s29, %s80_s12  }
  0x1d   : > { %s2392_s2 = sld [smem:[#allocation33_spill]]  ;;  %s345_s23 = scalar_lea.vmem [#allocation7], %s1863_s15 }
  0x1e   : > { %2391 = sst [smem:[#allocation30_spill]] %s1873_s18  ;;  %s353_s24 = sshll.u32 %s345_s23, 4  ;;  %s354_s24 = int_to_ptr.vmem [resolvable:$true] %s353_s24 }
  0x1f   : > { %s1881_s25 = scalar_lea.sflag [#allocation8], %s341_s19  ;;  %p1460_p8 = pneg %p1868_p7 }
  0x20   : > { %s1471_s26 = scalar_lea.vmem %s354_s24, 128  ;;  %s1761_s12 = smov [#allocation7]  }
  0x21   : > { %p1472_p9 = scmp.ne.s32.totalorder %s354_s24, %s1471_s26  ;;  %s1476_s13 = sshll.u32 %s1761_s12, 4  ;;  %s1477_s13 = int_to_ptr.vmem [resolvable:$false] %s1476_s13 }
  0x22   : > { %s1478_s11 = scalar_lea.vmem %s1477_s13, 256  ;;  %p1479_p12 = scmp.lt.s32.totalorder %s354_s24, %s1477_s13 }
  0x23   : > { %s351_s22 = scalar_lea.hbm %s2392_s2, %s1866_s16  ;;  %p1474_p10 = pnand %p1472_p9, %p1460_p8 }
  0x24   : > { %p1480_p13 = scmp.lt.s32.totalorder %s1478_s11, %s1471_s26 }
  0x25   : > { %p1475_p11 = pneg %p1474_p10 }
  0x26   : > { %p1481_p0 = por %p1480_p13, %p1479_p12 }
  0x28   : > { %p1482_p2 = pnand %p1481_p0, %p1475_p11 }
  0x2a   : > { %1485 = shalt.err (!%p1482_p2)
}
  0x2b   : > { %1361 = dma.hbm_to_vmem [thread:$0]  (!%p1868_p7), %s351_s22, 128, %s354_s24, %s1881_s25  }
  0x2c   : > { %s1892_s19 = sadd.s32 4294967295, %s1759_s10   ;;  %s2375_s11 = sadd.s32 4294967294, %s1759_s10  }
  0x2d   : > { %p93_p4 = scmp.ne.s32.totalorder %s1743_s28, %s1739_s27  ;;  %p2381_p5 = scmp.eq.s32.totalorder %s1892_s19, 0 }
  0x2e   : > { %p203_p6 = scmp.eq.s32.totalorder %s1892_s19, 1  ;;  %p209_p9 = scmp.eq.s32.totalorder %s2375_s11, 1 }
  0x2f   : > { %p1271_p10 = scmp.ge.s32.totalorder %s1759_s10, 1  ;;  %p1904_p11 = por %p2381_p5, %p93_p4 }
  0x30   : > { %p1911_p12 = por %p203_p6, %p87_p1  ;;  %p1915_p13 = por %p209_p9, %p93_p4 }
  0x31   : > { %p300_p0 = scmp.lt.s32.totalorder %s1759_s10, 3  ;;  %s2398_s1 = sld [smem:[#allocation32_spill]] }
  0x32   : > { %s2395_s22 = scalar_select %p1915_p13, 1, 0 }
  0x33   : > { %p1920_p2 = pnand %p1271_p10, %p300_p0  ;;  %s326_s13 = scalar_lea.vmem [#allocation6], %s1863_s15 }
  0x34   : > { %2396 = sst [smem:[#allocation31_spill]] %s2395_s22  ;;  %s334_s11 = sshll.u32 %s326_s13, 4  ;;  %s335_s11 = int_to_ptr.vmem [resolvable:$true] %s334_s11 }
  0x35   : > { %p1351_p3 = pneg %p1920_p2  ;;  %s323_s10 = scalar_lea.sflag [#allocation3], %s1860_s14 }
  0x36   : > { %s1499_s22 = scalar_lea.vmem %s335_s11, 128  ;;  %s1762_s24 = smov [#allocation6]  }
  0x37   : > { %s332_s12 = scalar_lea.hbm %s2398_s1, %s1866_s16  ;;  %p1933_p1 = pnand %p1351_p3, %p2381_p5 }
  0x38   : > { %p1500_p4 = scmp.ne.s32.totalorder %s335_s11, %s1499_s22  ;;  %s1504_s26 = sshll.u32 %s1762_s24, 4  ;;  %s1505_s26 = int_to_ptr.vmem [resolvable:$false] %s1504_s26 }
  0x39   : > { %s1506_s13 = scalar_lea.vmem %s1505_s26, 256  ;;  %p1507_p10 = scmp.lt.s32.totalorder %s335_s11, %s1505_s26 }
  0x3a   : > { %p1502_p6 = pnand %p1500_p4, %p1460_p8  ;;  %p1508_p3 = scmp.lt.s32.totalorder %s1506_s13, %s1499_s22 }
  0x3c   : > { %p1503_p9 = pneg %p1502_p6  ;;  %p1509_p0 = por %p1508_p3, %p1507_p10 }
  0x3e   : > { %p1510_p5 = pnand %p1509_p0, %p1503_p9 }
  0x40   : > { %1513 = shalt.err (!%p1510_p5)
}
  0x41   : > { %1358 = dma.hbm_to_vmem [thread:$0]  (!%p1868_p7), %s332_s12, 128, %s335_s11, %s323_s10  }
  0x42   : > { %s364_s9 = scalar_lea.vmem [#allocation9], %s1863_s15  ;;  %s1763_s29 = smov [#allocation2]  }
  0x43   : > { %s372_s18 = sshll.u32 %s364_s9, 4  ;;  %s1764_s22 = smov [#allocation9]   ;;  %s373_s18 = int_to_ptr.vmem [resolvable:$true] %s372_s18 }
  0x44   : > { %1354 = dma.hbm_to_smem (!%p1933_p1), %s2365_s0, 16, %s1763_s29, [#allocation5]  }
  0x45   : > { %s1538_s24 = scalar_lea.vmem %s373_s18, 128  ;;  %s1543_s26 = sshll.u32 %s1764_s22, 4  ;;  %s1544_s26 = int_to_ptr.vmem [resolvable:$false] %s1543_s26 }
  0x46   : > { %p1539_p4 = scmp.ne.s32.totalorder %s373_s18, %s1538_s24  ;;  %s1545_s13 = scalar_lea.vmem %s1544_s26, 256 }
  0x47   : > { %p1546_p9 = scmp.lt.s32.totalorder %s373_s18, %s1544_s26  ;;  %p1547_p10 = scmp.lt.s32.totalorder %s1545_s13, %s1538_s24 }
  0x48   : > { %p1541_p5 = pnand %p1539_p4, %p1460_p8 }
  0x49   : > { %p1548_p3 = por %p1547_p10, %p1546_p9 }
  0x4a   : > { %p1542_p6 = pneg %p1541_p5 }
  0x4c   : > { %p1549_p0 = pnand %p1548_p3, %p1542_p6 }
  0x4e   : > { %1552 = shalt.err (!%p1549_p0)
}
  0x4f   : > { %s2400_s27 = scalar_lea.hbm %s2368_s3, %s1866_s16  ;;  %s389_s11 = scalar_lea.hbm %s2369_s4, %s1866_s16 }
  0x50   : > { %1364 = dma.hbm_to_vmem [thread:$0]  (!%p1868_p7), %s2400_s27, 128, %s373_s18, %s1881_s25  }
  0x51   : > { %s383_s12 = scalar_lea.vmem [#allocation10], %s1863_s15  ;;  %s380_s24 = scalar_lea.sflag [#allocation11], %s1860_s14 }
  0x52   : > { %s391_s9 = sshll.u32 %s383_s12, 4  ;;  %s1765_s26 = smov [#allocation10]   ;;  %s392_s9 = int_to_ptr.vmem [resolvable:$true] %s391_s9 }
  0x53   : > { %s1566_s22 = scalar_lea.vmem %s392_s9, 128  ;;  %s1571_s13 = sshll.u32 %s1765_s26, 4  ;;  %s1572_s13 = int_to_ptr.vmem [resolvable:$false] %s1571_s13 }
  0x54   : > { %p1567_p1 = scmp.ne.s32.totalorder %s392_s9, %s1566_s22  ;;  %s1573_s1 = scalar_lea.vmem %s1572_s13, 256 }
  0x55   : > { %p1574_p6 = scmp.lt.s32.totalorder %s392_s9, %s1572_s13  ;;  %p1575_p9 = scmp.lt.s32.totalorder %s1573_s1, %s1566_s22 }
  0x56   : > { %p1569_p4 = pnand %p1567_p1, %p1460_p8 }
  0x57   : > { %p1576_p10 = por %p1575_p9, %p1574_p6 }
  0x58   : > { %p1570_p5 = pneg %p1569_p4 }
  0x5a   : > { %p1577_p3 = pnand %p1576_p10, %p1570_p5 }
  0x5c   : > { %1580 = shalt.err (!%p1577_p3)
}
  0x5d   : > { %1367 = dma.hbm_to_vmem [thread:$0]  (!%p1868_p7), %s389_s11, 128, %s392_s9, %s380_s24  }
  0x5e   : > { %400 = sbr.rel (%p1920_p2) target bundleno = 458 (0x1ca), region = 40  ;;  %p2401_p0 = scmp.eq.s32.totalorder (!%p1920_p2), %s1892_s19, 0 }
  0x63   : > { %1710 = dma.done.wait (%p2401_p0), [#allocation5], 16   ;;  %p2402_p8 = pmov %p2401_p0 }
  0x64   : > { %s1982_s14 = sand.u32 1, %s1743_s28  }
  0x65   : > { %1712 = vsyncadd (%p2402_p8), [#allocation5], 4294967280  ;;  %s1985_s15 = sshll.u32 %s1982_s14, 3  ;;  %s407_s16 = scalar_lea.sflag [#allocation3], %s1982_s14 }
  0x66   : > { %s410_s17 = scalar_lea.vmem [#allocation6], %s1985_s15 }
  0x67   : > { %1714 = dma.done.wait (%p1904_p11), %s407_s16, 128  }
  0x68   : > { %1716 = vsyncadd (%p1904_p11), %s407_s16, 4294967168  ;;  %s415_s25 = sand.u32 1, %s1892_s19   ;;  %s419_s18 = scalar_lea.vmem [#allocation7], %s1985_s15 }
  0x69   : > { %s416_s23 = scalar_lea.sflag [#allocation8], %s415_s25 }
  0x6a   : > { %1718 = dma.done.wait (%p1904_p11), %s416_s23, 256  }
  0x6b   : > { %1720 = vsyncadd (%p1904_p11), %s416_s23, 4294967040  ;;  %s428_s2 = scalar_lea.vmem [#allocation9], %s1985_s15  ;;  %s434_s27 = scalar_lea.sflag [#allocation11], %s1982_s14 }
  0x6c   : > { %s437_s29 = scalar_lea.vmem [#allocation10], %s1985_s15 }
  0x6d   : > { %1722 = dma.done.wait (%p1904_p11), %s434_s27, 128  }
  0x6e   : > { %1724 = vsyncadd (%p1904_p11), %s434_s27, 4294967168 }
  0x6f   : > { %442 = sfence }
  0x70   : > { %s503_s10 = sld [smem:[#allocation2]]  ;;  %v501_v0 = vld [vmem:[%s410_s17] sm:$0xff]  ;;  %v502_v1 = vld [vmem:[%s419_s18] sm:$0xff] }
  0x71   : > { %s1292_s11 = sld [smem:[#allocation2 + $0x1]]  ;;  %v669_v13 = vld [vmem:[%s428_s2] sm:$0xff]  ;;  %v670_v19 = vld [vmem:[%s437_s29] sm:$0xff] }
  0x72   : > { %s1293_s12 = sld [smem:[#allocation2 + $0x2]] }
  0x73   : > { %s1294_s9 = sld [smem:[#allocation2 + $0x3]] }
  0x74   : > { %s1296_s24 = sld [smem:[#allocation2 + $0x5]] }
  0x75   : > { %s1299_s22 = sld [smem:[#allocation2 + $0x8]] }
  0x76   : > { %v516_v3 = vstv %s503_s10  ;;  %s1300_s26 = sld [smem:[#allocation2 + $0x9]] }
  0x77   : > { %v520_v6 = vstv %s1292_s11  ;;  %s1301_s20 = sld [smem:[#allocation2 + $0xa]] }
  0x78   : > { %v514_v2 = vstv %s1293_s12  ;;  %s1302_s13 = sld [smem:[#allocation2 + $0xb]] }
  0x79   : > { %v515_v4 = vsub.f32 %v501_v0, %v514_v2  ;;  %v518_v5 = vstv %s1294_s9  ;;  %s1303_s1 = sld [smem:[#allocation2 + $0xc]] }
  0x7a   : > { %v519_v7 = vsub.f32 %v502_v1, %v518_v5  ;;  %s1295_s16 = sld [smem:[#allocation2 + $0x4]]  ;;  %v2020_v15 = vstv %s1296_s24 }
  0x7b   : > { %v2008_v8 = vmul.f32 %v516_v3, %v515_v4  ;;  %v2016_v12 = vstv %s1299_s22  ;;  %s1308_s17 = sld [smem:[#allocation2 + $0x11]] }
  0x7c   : > { %v2010_v9 = vmul.f32 %v520_v6, %v519_v7  ;;  %v684_v17 = vstv %s1300_s26  ;;  %s1305_s23 = sld [smem:[#allocation2 + $0xe]] }
  0x7d   : > { %v522_v10 = vmul.f32 %v2008_v8, %v2008_v8  ;;  %v688_v24 = vstv %s1301_s20  ;;  %s1297_s18 = sld [smem:[#allocation2 + $0x6]] }
  0x7e   : > { %v523_v11 = vmul.f32 %v2010_v9, %v2010_v9  ;;  %v682_v16 = vstv %s1302_s13  ;;  %s1298_s2 = sld [smem:[#allocation2 + $0x7]]  ;;  %v524_v43 = vmul.f32 %v2010_v9, %v2008_v8 }
  0x7f   : > { %v683_v20 = vsub.f32 %v669_v13, %v682_v16  ;;  %v686_v21 = vstv %s1303_s1  ;;  %s1304_s27 = sld [smem:[#allocation2 + $0xd]]  ;;  %v541_v38 = vmul.f32 2.0, %v522_v10 }
  0x80   : > { %v525_v14 = vadd.f32 %v523_v11, %v522_v10  ;;  %v2028_v25 = vstv %s1295_s16  ;;  %v687_v26 = vsub.f32 %v670_v19, %v686_v21  ;;  %v546_v39 = vmul.f32 2.0, %v523_v11  ;;  %s1306_s11 = sld [smem:[#allocation2 + $0xf]] }
  0x81   : > { %v2026_v23 = vmul.f32 %v684_v17, %v683_v20  ;;  %v2037_v33 = vstv %s1308_s17  ;;  %s2049_s12 = sld [smem:[#allocation2 + $0x10]] }
  0x82   : > { %v527_v18 = vmul.f32 %v2016_v12, %v525_v14  ;;  %v2030_v28 = vmul.f32 %v688_v24, %v687_v26  ;;  %v2039_v36 = vstv %s1305_s23  ;;  %v542_v44 = vadd.f32 %v541_v38, %v525_v14  ;;  %s2142_s22 = sld [smem:[#allocation2 + $0x12]] }
  0x83   : > { %v690_v29 = vmul.f32 %v2026_v23, %v2026_v23  ;;  %s512_s29 = smul.f32 2.0, %s1297_s18  ;;  %v547_v45 = vadd.f32 %v546_v39, %v525_v14  ;;  %v2047_v46 = vstv %s1297_s18  ;;  %s2144_s26 = sld [smem:[#allocation2 + $0x13]] }
  0x84   : > { %v529_v22 = vadd.f32 %v2020_v15, %v527_v18  ;;  %v691_v31 = vmul.f32 %v2030_v28, %v2030_v28  ;;  %s513_s10 = smul.f32 2.0, %s1298_s2  ;;  %v2053_v48 = vstv %s1298_s2  ;;  %v692_v1 = vmul.f32 %v2030_v28, %v2026_v23  ;;  %s2150_s20 = sld [smem:[#allocation2 + $0x15]] }
  0x85   : > { %v2043_v41 = vstv %s1304_s27  ;;  %v2051_v47 = vstv %s512_s29  ;;  %v544_v53 = vmul.f32 %v2053_v48, %v542_v44  ;;  %v549_v54 = vmul.f32 %v2047_v46, %v547_v45  ;;  %s2152_s13 = sld [smem:[#allocation2 + $0x16]] }
  0x86   : > { %v530_v27 = vmul.f32 %v529_v22, %v525_v14  ;;  %v693_v34 = vadd.f32 %v691_v31, %v690_v29  ;;  %v2055_v49 = vstv %s513_s10  ;;  %v540_v52 = vmul.f32 %v2051_v47, %v524_v43  ;;  %s680_s9 = smul.f32 2.0, %s1306_s11  ;;  %s2154_s1 = sld [smem:[#allocation2 + $0x14]] }
  0x87   : > { %v551_v55 = vmul.f32 %v2055_v49, %v524_v43  ;;  %v709_v57 = vmul.f32 2.0, %v690_v29  ;;  %v714_v58 = vmul.f32 2.0, %v691_v31  ;;  %s681_s24 = smul.f32 2.0, %s2049_s12  ;;  %v2065_v0 = vstv %s1306_s11  ;;  %s2156_s16 = sld [smem:[#allocation2 + $0x18]] }
  0x88   : > { %v532_v30 = vadd.f32 %v2028_v25, %v530_v27  ;;  %v695_v37 = vmul.f32 %v2037_v33, %v693_v34  ;;  %v545_v59 = vadd.f32 %v544_v53, %v540_v52  ;;  %v2063_v63 = vstv %s680_s9  ;;  %s2158_s17 = sld [smem:[#allocation2 + $0x19]]  ;;  %s486_s10 = scalar_lea.vmem [#allocation13], %s1985_s15 }
  0x89   : > { %v552_v60 = vadd.f32 %v551_v55, %v549_v54  ;;  %v710_v2 = vadd.f32 %v709_v57, %v693_v34  ;;  %v2070_v3 = vstv %s2049_s12  ;;  %v715_v4 = vadd.f32 %v714_v58, %v693_v34  ;;  %s2160_s23 = sld [smem:[#allocation2 + $0x17]]  ;;  %s984_s11 = sshll.u32 %s486_s10, 4  ;;  %s2216_s11 = int_to_ptr.vmem [resolvable:$true] %s984_s11 }
  0x8a   : > { %v533_v32 = vmul.f32 %v532_v30, %v525_v14  ;;  %v697_v40 = vadd.f32 %v2039_v36, %v695_v37  ;;  %v553_v6 = vsub.f32 %v2008_v8, %v545_v59  ;;  %v2074_v10 = vstv %s681_s24  ;;  %s2164_s18 = sld [smem:[#allocation2 + $0x1a]]  ;;  %s479_s12 = scalar_lea.vmem [#allocation12], %s1985_s15 }
  0x8b   : > { %v555_v7 = vsub.f32 %v2010_v9, %v552_v60  ;;  %v708_v13 = vmul.f32 %v2063_v63, %v692_v1  ;;  %v712_v14 = vmul.f32 %v2070_v3, %v710_v2  ;;  %v717_v16 = vmul.f32 %v2065_v0, %v715_v4  ;;  %s1318_s2 = sld [smem:[#allocation2 + $0x1b]]  ;;  %s970_s9 = sshll.u32 %s479_s12, 4  ;;  %s2218_s9 = int_to_ptr.vmem [resolvable:$true] %s970_s9 }
  0x8c   : > { %v534_v35 = vadd.f32 1.0, %v533_v32  ;;  %v698_v42 = vmul.f32 %v697_v40, %v693_v34  ;;  %v719_v17 = vmul.f32 %v2074_v10, %v692_v1  ;;  %s1319_s27 = sld [smem:[#allocation2 + $0x1c]]  ;;  %s2212_s24 = sshll.u32 %s1751_s30, 7 }
  0x8d   : > { %v713_v22 = vadd.f32 %v712_v14, %v708_v13  ;;  %s1320_s29 = sld [smem:[#allocation2 + $0x1d]] }
  0x8e   : > { %1434 = vrcp.f32 %v534_v35  ;;  %v700_v50 = vadd.f32 %v2043_v41, %v698_v42  ;;  %v720_v24 = vadd.f32 %v719_v17, %v717_v16 }
  0x8f   : > { %v721_v32 = vsub.f32 %v2026_v23, %v713_v22 }
  0x90   : > { %v701_v51 = vmul.f32 %v700_v50, %v693_v34  ;;  %v723_v34 = vsub.f32 %v2030_v28, %v720_v24 }
  0x92   : > { %v702_v56 = vadd.f32 1.0, %v701_v51 }
  0x94   : > { %1436 = vrcp.f32 %v702_v56 }
  0x9b   : > { %v1435_v61 = vpop.eup %1434 }
  0x9c   : > { %v536_v62 = vmul.f32 %v1435_v61, %v534_v35 }
  0x9e   : > { %v537_v5 = vsub.f32 2.0, %v536_v62 }
  0xa0   : > { %v538_v11 = vmul.f32 %v1435_v61, %v537_v5 }
  0xa1   : > { %v1437_v26 = vpop.eup %1436 }
  0xa2   : > { %v554_v18 = vmul.f32 %v553_v6, %v538_v11  ;;  %v556_v19 = vmul.f32 %v555_v7, %v538_v11  ;;  %v704_v29 = vmul.f32 %v1437_v26, %v702_v56 }
  0xa4   : > { %v557_v20 = vmul.f32 %v554_v18, %v554_v18  ;;  %v558_v21 = vmul.f32 %v556_v19, %v556_v19  ;;  %v705_v31 = vsub.f32 2.0, %v704_v29  ;;  %v559_v57 = vmul.f32 %v556_v19, %v554_v18 }
  0xa6   : > { %v560_v27 = vadd.f32 %v558_v21, %v557_v20  ;;  %v706_v37 = vmul.f32 %v1437_v26, %v705_v31  ;;  %v572_v53 = vmul.f32 2.0, %v557_v20  ;;  %v576_v54 = vmul.f32 2.0, %v558_v21 }
  0xa7   : > { %v571_v62 = vmul.f32 %v559_v57, %v2051_v47  ;;  %v579_v4 = vmul.f32 %v559_v57, %v2055_v49 }
  0xa8   : > { %v561_v30 = vmul.f32 %v560_v27, %v2016_v12  ;;  %v722_v39 = vmul.f32 %v721_v32, %v706_v37  ;;  %v724_v40 = vmul.f32 %v723_v34, %v706_v37  ;;  %v573_v58 = vadd.f32 %v572_v53, %v560_v27 }
  0xa9   : > { %v577_v59 = vadd.f32 %v576_v54, %v560_v27 }
  0xaa   : > { %v562_v35 = vadd.f32 %v561_v30, %v2020_v15  ;;  %v725_v43 = vmul.f32 %v722_v39, %v722_v39  ;;  %v726_v44 = vmul.f32 %v724_v40, %v724_v40  ;;  %v574_v1 = vmul.f32 %v573_v58, %v2053_v48 }
  0xab   : > { %v578_v2 = vmul.f32 %v577_v59, %v2047_v46  ;;  %v727_v17 = vmul.f32 %v724_v40, %v722_v39 }
  0xac   : > { %v563_v38 = vmul.f32 %v562_v35, %v560_v27  ;;  %v728_v50 = vadd.f32 %v726_v44, %v725_v43  ;;  %v740_v6 = vmul.f32 2.0, %v725_v43  ;;  %v744_v7 = vmul.f32 2.0, %v726_v44 }
  0xad   : > { %v575_v11 = vadd.f32 %v574_v1, %v571_v62  ;;  %v580_v13 = vadd.f32 %v579_v4, %v578_v2  ;;  %v739_v26 = vmul.f32 %v727_v17, %v2063_v63  ;;  %v747_v30 = vmul.f32 %v727_v17, %v2074_v10 }
  0xae   : > { %v564_v42 = vadd.f32 %v563_v38, %v2028_v25  ;;  %v729_v52 = vmul.f32 %v728_v50, %v2037_v33  ;;  %v741_v18 = vadd.f32 %v740_v6, %v728_v50  ;;  %v745_v19 = vadd.f32 %v744_v7, %v728_v50 }
  0xaf   : > { %v581_v21 = vsub.f32 %v2008_v8, %v575_v11  ;;  %v583_v22 = vsub.f32 %v2010_v9, %v580_v13 }
  0xb0   : > { %v565_v45 = vmul.f32 %v564_v42, %v560_v27  ;;  %v730_v55 = vadd.f32 %v729_v52, %v2039_v36  ;;  %v742_v27 = vmul.f32 %v741_v18, %v2070_v3  ;;  %v746_v29 = vmul.f32 %v745_v19, %v2065_v0 }
  0xb2   : > { %v566_v51 = vadd.f32 1.0, %v565_v45  ;;  %v731_v56 = vmul.f32 %v730_v55, %v728_v50  ;;  %v743_v37 = vadd.f32 %v742_v27, %v739_v26  ;;  %v748_v38 = vadd.f32 %v747_v30, %v746_v29 }
  0xb4   : > { %1438 = vrcp.f32 %v566_v51  ;;  %v732_v60 = vadd.f32 %v731_v56, %v2043_v41  ;;  %v749_v45 = vsub.f32 %v2026_v23, %v743_v37 }
  0xb6   : > { %v733_v61 = vmul.f32 %v732_v60, %v728_v50  ;;  %v751_v50 = vsub.f32 %v2030_v28, %v748_v38 }
  0xb8   : > { %v734_v5 = vadd.f32 1.0, %v733_v61 }
  0xba   : > { %1440 = vrcp.f32 %v734_v5 }
  0xc1   : > { %v1439_v14 = vpop.eup %1438 }
  0xc2   : > { %v568_v16 = vmul.f32 %v1439_v14, %v566_v51 }
  0xc4   : > { %v569_v20 = vsub.f32 2.0, %v568_v16 }
  0xc6   : > { %v570_v24 = vmul.f32 %v1439_v14, %v569_v20 }
  0xc7   : > { %v1441_v39 = vpop.eup %1440 }
  0xc8   : > { %v582_v31 = vmul.f32 %v581_v21, %v570_v24  ;;  %v584_v32 = vmul.f32 %v583_v22, %v570_v24  ;;  %v736_v42 = vmul.f32 %v1441_v39, %v734_v5 }
  0xca   : > { %v585_v34 = vmul.f32 %v582_v31, %v582_v31  ;;  %v586_v35 = vmul.f32 %v584_v32, %v584_v32  ;;  %v737_v44 = vsub.f32 2.0, %v736_v42  ;;  %v587_v6 = vmul.f32 %v584_v32, %v582_v31 }
  0xcc   : > { %v588_v40 = vadd.f32 %v586_v35, %v585_v34  ;;  %v738_v52 = vmul.f32 %v1441_v39, %v737_v44  ;;  %v600_v1 = vmul.f32 2.0, %v585_v34  ;;  %v604_v2 = vmul.f32 2.0, %v586_v35 }
  0xcd   : > { %v599_v16 = vmul.f32 %v587_v6, %v2051_v47  ;;  %v607_v19 = vmul.f32 %v587_v6, %v2055_v49 }
  0xce   : > { %v589_v43 = vmul.f32 %v588_v40, %v2016_v12  ;;  %v750_v54 = vmul.f32 %v749_v45, %v738_v52  ;;  %v752_v55 = vmul.f32 %v751_v50, %v738_v52  ;;  %v601_v7 = vadd.f32 %v600_v1, %v588_v40 }
  0xcf   : > { %v605_v11 = vadd.f32 %v604_v2, %v588_v40 }
  0xd0   : > { %v590_v51 = vadd.f32 %v589_v43, %v2020_v15  ;;  %v753_v57 = vmul.f32 %v750_v54, %v750_v54  ;;  %v754_v58 = vmul.f32 %v752_v55, %v752_v55  ;;  %v602_v17 = vmul.f32 %v601_v7, %v2053_v48 }
  0xd1   : > { %v606_v18 = vmul.f32 %v605_v11, %v2047_v46  ;;  %v755_v30 = vmul.f32 %v752_v55, %v750_v54 }
  0xd2   : > { %v591_v53 = vmul.f32 %v590_v51, %v588_v40  ;;  %v756_v60 = vadd.f32 %v754_v58, %v753_v57  ;;  %v768_v21 = vmul.f32 2.0, %v753_v57  ;;  %v772_v22 = vmul.f32 2.0, %v754_v58 }
  0xd3   : > { %v603_v24 = vadd.f32 %v602_v17, %v599_v16  ;;  %v608_v26 = vadd.f32 %v607_v19, %v606_v18  ;;  %v767_v39 = vmul.f32 %v755_v30, %v2063_v63  ;;  %v775_v43 = vmul.f32 %v755_v30, %v2074_v10 }
  0xd4   : > { %v592_v56 = vadd.f32 %v591_v53, %v2028_v25  ;;  %v757_v62 = vmul.f32 %v756_v60, %v2037_v33  ;;  %v769_v31 = vadd.f32 %v768_v21, %v756_v60  ;;  %v773_v32 = vadd.f32 %v772_v22, %v756_v60 }
  0xd5   : > { %v609_v35 = vsub.f32 %v2008_v8, %v603_v24  ;;  %v611_v37 = vsub.f32 %v2010_v9, %v608_v26 }
  0xd6   : > { %v593_v59 = vmul.f32 %v592_v56, %v588_v40  ;;  %v758_v4 = vadd.f32 %v757_v62, %v2039_v36  ;;  %v770_v40 = vmul.f32 %v769_v31, %v2070_v3  ;;  %v774_v42 = vmul.f32 %v773_v32, %v2065_v0 }
  0xd8   : > { %v594_v61 = vadd.f32 1.0, %v593_v59  ;;  %v759_v5 = vmul.f32 %v758_v4, %v756_v60  ;;  %v771_v52 = vadd.f32 %v770_v40, %v767_v39  ;;  %v776_v53 = vadd.f32 %v775_v43, %v774_v42 }
  0xda   : > { %1442 = vrcp.f32 %v594_v61  ;;  %v760_v13 = vadd.f32 %v759_v5, %v2043_v41  ;;  %v777_v59 = vsub.f32 %v2026_v23, %v771_v52 }
  0xdc   : > { %v761_v14 = vmul.f32 %v760_v13, %v756_v60  ;;  %v779_v60 = vsub.f32 %v2030_v28, %v776_v53 }
  0xde   : > { %v762_v20 = vadd.f32 1.0, %v761_v14 }
  0xe0   : > { %1444 = vrcp.f32 %v762_v20 }
  0xe7   : > { %v1443_v27 = vpop.eup %1442 }
  0xe8   : > { %v596_v29 = vmul.f32 %v1443_v27, %v594_v61 }
  0xea   : > { %v597_v34 = vsub.f32 2.0, %v596_v29 }
  0xec   : > { %v598_v38 = vmul.f32 %v1443_v27, %v597_v34 }
  0xed   : > { %v1445_v54 = vpop.eup %1444 }
  0xee   : > { %v610_v44 = vmul.f32 %v609_v35, %v598_v38  ;;  %v612_v45 = vmul.f32 %v611_v37, %v598_v38  ;;  %v764_v56 = vmul.f32 %v1445_v54, %v762_v20 }
  0xf0   : > { %v613_v50 = vmul.f32 %v610_v44, %v610_v44  ;;  %v614_v51 = vmul.f32 %v612_v45, %v612_v45  ;;  %v765_v58 = vsub.f32 2.0, %v764_v56  ;;  %v615_v21 = vmul.f32 %v612_v45, %v610_v44 }
  0xf2   : > { %v616_v55 = vadd.f32 %v614_v51, %v613_v50  ;;  %v766_v62 = vmul.f32 %v1445_v54, %v765_v58  ;;  %v628_v17 = vmul.f32 2.0, %v613_v50  ;;  %v632_v18 = vmul.f32 2.0, %v614_v51 }
  0xf3   : > { %v627_v29 = vmul.f32 %v615_v21, %v2051_v47  ;;  %v635_v32 = vmul.f32 %v615_v21, %v2055_v49 }
  0xf4   : > { %v617_v57 = vmul.f32 %v616_v55, %v2016_v12  ;;  %v778_v2 = vmul.f32 %v777_v59, %v766_v62  ;;  %v780_v4 = vmul.f32 %v779_v60, %v766_v62  ;;  %v629_v22 = vadd.f32 %v628_v17, %v616_v55 }
  0xf5   : > { %v633_v24 = vadd.f32 %v632_v18, %v616_v55 }
  0xf6   : > { %v618_v61 = vadd.f32 %v617_v57, %v2020_v15  ;;  %v781_v6 = vmul.f32 %v778_v2, %v778_v2  ;;  %v782_v7 = vmul.f32 %v780_v4, %v780_v4  ;;  %v630_v30 = vmul.f32 %v629_v22, %v2053_v48 }
  0xf7   : > { %v634_v31 = vmul.f32 %v633_v24, %v2047_v46  ;;  %v783_v43 = vmul.f32 %v780_v4, %v778_v2 }
  0xf8   : > { %v619_v1 = vmul.f32 %v618_v61, %v616_v55  ;;  %v784_v13 = vadd.f32 %v782_v7, %v781_v6  ;;  %v796_v35 = vmul.f32 2.0, %v781_v6  ;;  %v800_v37 = vmul.f32 2.0, %v782_v7 }
  0xf9   : > { %v631_v38 = vadd.f32 %v630_v30, %v627_v29  ;;  %v636_v39 = vadd.f32 %v635_v32, %v634_v31  ;;  %v795_v54 = vmul.f32 %v783_v43, %v2063_v63  ;;  %v803_v57 = vmul.f32 %v783_v43, %v2074_v10 }
  0xfa   : > { %v620_v5 = vadd.f32 %v619_v1, %v2028_v25  ;;  %v785_v16 = vmul.f32 %v784_v13, %v2037_v33  ;;  %v797_v44 = vadd.f32 %v796_v35, %v784_v13  ;;  %v801_v45 = vadd.f32 %v800_v37, %v784_v13 }
  0xfb   : > { %v637_v51 = vsub.f32 %v2008_v8, %v631_v38  ;;  %v639_v52 = vsub.f32 %v2010_v9, %v636_v39 }
  0xfc   : > { %v621_v11 = vmul.f32 %v620_v5, %v616_v55  ;;  %v786_v19 = vadd.f32 %v785_v16, %v2039_v36  ;;  %v798_v55 = vmul.f32 %v797_v44, %v2070_v3  ;;  %v802_v56 = vmul.f32 %v801_v45, %v2065_v0 }
  0xfe   : > { %v622_v14 = vadd.f32 1.0, %v621_v11  ;;  %v787_v20 = vmul.f32 %v786_v19, %v784_v13  ;;  %v799_v62 = vadd.f32 %v798_v55, %v795_v54  ;;  %v804_v1 = vadd.f32 %v803_v57, %v802_v56 }
  0xff   : > { %v851_v55 = vstv %s2144_s26  ;;  %v856_v56 = vstv %s2150_s20  ;;  %v858_v57 = vstv %s2152_s13  ;;  %s2229_s13 = scalar_lea.hbm %s2371_s6, %s2212_s24 }
 0x100   : > { %1446 = vrcp.f32 %v622_v14  ;;  %v788_v26 = vadd.f32 %v787_v20, %v2043_v41  ;;  %v805_v11 = vsub.f32 %v2026_v23, %v799_v62 }
 0x102   : > { %v789_v27 = vmul.f32 %v788_v26, %v784_v13  ;;  %v807_v13 = vsub.f32 %v2030_v28, %v804_v1  ;;  %v865_v1 = vstv %s2158_s17  ;;  %s2238_s17 = scalar_lea.hbm %s2370_s5, %s2212_s24 }
 0x104   : > { %v790_v34 = vadd.f32 1.0, %v789_v27 }
 0x106   : > { %1448 = vrcp.f32 %v790_v34 }
 0x10d   : > { %v1447_v40 = vpop.eup %1446 }
 0x10e   : > { %v624_v42 = vmul.f32 %v1447_v40, %v622_v14 }
 0x110   : > { %v625_v50 = vsub.f32 2.0, %v624_v42 }
 0x112   : > { %v626_v53 = vmul.f32 %v1447_v40, %v625_v50 }
 0x113   : > { %v1449_v2 = vpop.eup %1448 }
 0x114   : > { %v638_v58 = vmul.f32 %v637_v51, %v626_v53  ;;  %v640_v59 = vmul.f32 %v639_v52, %v626_v53  ;;  %v792_v5 = vmul.f32 %v1449_v2, %v790_v34  ;;  %v849_v53 = vstv %s2142_s22  ;;  %s493_s22 = scalar_lea.vmem [#allocation15], %s1985_s15 }
 0x115   : > { %s998_s26 = sshll.u32 %s493_s22, 4  ;;  %s2240_s26 = int_to_ptr.vmem [resolvable:$true] %s998_s26 }
 0x116   : > { %v641_v60 = vmul.f32 %v638_v58, %v638_v58  ;;  %v642_v61 = vmul.f32 %v640_v59, %v640_v59  ;;  %v793_v7 = vsub.f32 2.0, %v792_v5 }
 0x118   : > { %v644_v4 = vadd.f32 %v642_v61, %v641_v60  ;;  %v794_v16 = vmul.f32 %v1449_v2, %v793_v7  ;;  %v656_v29 = vmul.f32 2.0, %v641_v60  ;;  %v660_v30 = vmul.f32 2.0, %v642_v61 }
 0x119   : > { %v854_v2 = vstv %s2154_s1 }
 0x11a   : > { %v645_v6 = vmul.f32 %v644_v4, %v2016_v12  ;;  %v806_v18 = vmul.f32 %v805_v11, %v794_v16  ;;  %v808_v19 = vmul.f32 %v807_v13, %v794_v16  ;;  %v657_v34 = vadd.f32 %v656_v29, %v644_v4 }
 0x11b   : > { %v661_v35 = vadd.f32 %v660_v30, %v644_v4 }
 0x11c   : > { %v646_v14 = vadd.f32 %v645_v6, %v2020_v15  ;;  %v809_v21 = vmul.f32 %v806_v18, %v806_v18  ;;  %v810_v22 = vmul.f32 %v808_v19, %v808_v19  ;;  %v643_v15 = vmul.f32 %v640_v59, %v638_v58 }
 0x11d   : > { %v662_v39 = vmul.f32 %v661_v35, %v2047_v46  ;;  %v811_v43 = vmul.f32 %v808_v19, %v806_v18 }
 0x11e   : > { %v647_v17 = vmul.f32 %v646_v14, %v644_v4  ;;  %v812_v26 = vadd.f32 %v810_v22, %v809_v21  ;;  %v655_v38 = vmul.f32 %v643_v15, %v2051_v47  ;;  %v663_v40 = vmul.f32 %v643_v15, %v2055_v49 }
 0x11f   : > { %v828_v42 = vmul.f32 2.0, %v810_v22  ;;  %v823_v58 = vmul.f32 %v811_v43, %v2063_v63  ;;  %v831_v61 = vmul.f32 %v811_v43, %v2074_v10 }
 0x120   : > { %v648_v20 = vadd.f32 %v647_v17, %v2028_v25  ;;  %v813_v12 = vmul.f32 %v812_v26, %v2037_v33  ;;  %v658_v33 = vmul.f32 %v657_v34, %v2053_v48  ;;  %v664_v48 = vadd.f32 %v663_v40, %v662_v39 }
 0x121   : > { %v829_v45 = vadd.f32 %v828_v42, %v812_v26  ;;  %v868_v17 = vstv %s2164_s18  ;;  %v883_v39 = vstv %s1318_s2  ;;  %v885_v40 = vstv %s1319_s27  ;;  %s2246_s2 = scalar_lea.hbm %s2372_s7, %s2212_s24  ;;  %s2250_s27 = scalar_lea.sflag [#allocation14], %s415_s25 }
 0x122   : > { %v649_v24 = vmul.f32 %v648_v20, %v644_v4  ;;  %v814_v31 = vadd.f32 %v813_v12, %v2039_v36  ;;  %v659_v47 = vadd.f32 %v658_v33, %v655_v38  ;;  %v667_v52 = vsub.f32 %v2010_v9, %v664_v48 }
 0x123   : > { %v830_v60 = vmul.f32 %v829_v45, %v2065_v0  ;;  %v863_v9 = vstv %s2156_s16  ;;  %v861_v4 = vstv %s2160_s23  ;;  %v888_v42 = vstv %s1320_s29  ;;  %s1581_s29 = scalar_lea.vmem %s2216_s11, 128 }
 0x124   : > { %v650_v27 = vadd.f32 1.0, %v649_v24  ;;  %v815_v32 = vmul.f32 %v814_v31, %v812_v26  ;;  %v665_v51 = vsub.f32 %v2008_v8, %v659_v47  ;;  %p1582_p7 = scmp.ne.s32.totalorder %s2216_s11, %s1581_s29 }
 0x125   : > { %v832_v7 = vadd.f32 %v831_v61, %v830_v60 }
 0x126   : > { %1450 = vrcp.f32 %v650_v27  ;;  %v816_v37 = vadd.f32 %v815_v32, %v2043_v41  ;;  %v824_v41 = vmul.f32 2.0, %v809_v21  ;;  %p1583_p11 = pnand %p1582_p7, %p1911_p12 }
 0x128   : > { %v817_v25 = vmul.f32 %v816_v37, %v812_v26  ;;  %v825_v44 = vadd.f32 %v824_v41, %v812_v26  ;;  %v835_v26 = vsub.f32 %v2030_v28, %v832_v7  ;;  %p1584_p2 = pneg %p1583_p11 }
 0x12a   : > { %v818_v36 = vadd.f32 1.0, %v817_v25  ;;  %v826_v59 = vmul.f32 %v825_v44, %v2070_v3 }
 0x12c   : > { %1452 = vrcp.f32 %v818_v36  ;;  %v827_v0 = vadd.f32 %v826_v59, %v823_v58 }
 0x12e   : > { %v833_v24 = vsub.f32 %v2026_v23, %v827_v0 }
 0x133   : > { %v1451_v46 = vpop.eup %1450 }
 0x134   : > { %v652_v49 = vmul.f32 %v1451_v46, %v650_v27 }
 0x136   : > { %v653_v50 = vsub.f32 2.0, %v652_v49 }
 0x138   : > { %v654_v54 = vmul.f32 %v1451_v46, %v653_v50 }
 0x139   : > { %v1453_v13 = vpop.eup %1452 }
 0x13a   : > { %v2174_v8 = vmul.f32 %v665_v51, %v654_v54  ;;  %v2176_v62 = vmul.f32 %v667_v52, %v654_v54  ;;  %v820_v18 = vmul.f32 %v1453_v13, %v818_v36 }
 0x13c   : > { %v850_v5 = vmul.f32 %v849_v53, %v2174_v8  ;;  %v852_v6 = vmul.f32 %v851_v55, %v2176_v62  ;;  %v857_v63 = vmul.f32 %v856_v56, %v2174_v8  ;;  %v859_v3 = vmul.f32 %v858_v57, %v2176_v62 }
 0x13d   : > { %v864_v10 = vmul.f32 %v863_v9, %v2174_v8  ;;  %v866_v11 = vmul.f32 %v865_v1, %v2176_v62  ;;  %v821_v22 = vsub.f32 2.0, %v820_v18 }
 0x13e   : > { %v853_v14 = vadd.f32 %v852_v6, %v850_v5  ;;  %v860_v16 = vadd.f32 %v859_v3, %v857_v63 }
 0x13f   : > { %v867_v19 = vadd.f32 %v866_v11, %v864_v10  ;;  %v822_v30 = vmul.f32 %v1453_v13, %v821_v22 }
 0x140   : > { %v2189_v20 = vadd.f32 %v854_v2, %v853_v14  ;;  %v2191_v21 = vadd.f32 %v861_v4, %v860_v16 }
 0x141   : > { %v2195_v27 = vadd.f32 %v868_v17, %v867_v19  ;;  %v834_v31 = vmul.f32 %v833_v24, %v822_v30  ;;  %v836_v32 = vmul.f32 %v835_v26, %v822_v30 }
 0x142   : > { %v870_v12 = vmul.f32 %v2189_v20, %v2189_v20  ;;  %v871_v29 = vmul.f32 %v2191_v21, %v2191_v21  ;;  %v884_v47 = vmul.f32 %v883_v39, %v2189_v20  ;;  %v886_v48 = vmul.f32 %v885_v40, %v2191_v21 }
 0x143   : > { %v873_v23 = vmul.f32 %v2195_v27, %v2195_v27  ;;  %v875_v34 = vmul.f32 %v834_v31, %v834_v31  ;;  %v876_v28 = vmul.f32 %v836_v32, %v836_v32  ;;  %v879_v35 = vmul.f32 %v2189_v20, %v834_v31 }
 0x144   : > { %v872_v15 = vadd.f32 %v871_v29, %v870_v12  ;;  %v880_v37 = vmul.f32 %v2191_v21, %v836_v32  ;;  %v889_v44 = vmul.f32 %v888_v42, %v2195_v27  ;;  %v887_v45 = vadd.f32 %v886_v48, %v884_v47 }
 0x145   : > { %v877_v38 = vadd.f32 %v876_v28, %v875_v34  ;;  %v892_v50 = vmul.f32 %v883_v39, %v834_v31  ;;  %v893_v51 = vmul.f32 %v885_v40, %v836_v32 }
 0x146   : > { %v874_v25 = vadd.f32 %v873_v23, %v872_v15  ;;  %v881_v33 = vadd.f32 %v880_v37, %v879_v35  ;;  %v890_v52 = vadd.f32 %v889_v44, %v887_v45 }
 0x147   : > { %v878_v36 = vadd.f32 1.0, %v877_v38  ;;  %v894_v53 = vadd.f32 %v893_v51, %v892_v50 }
 0x148   : > { %v882_v41 = vadd.f32 %v881_v33, %v2195_v27  ;;  %v891_v54 = vsub.f32 0.0, %v890_v52 }
 0x149   : > { %v896_v46 = vmul.f32 %v878_v36, %v874_v25  ;;  %v895_v55 = vadd.f32 %v894_v53, %v888_v42 }
 0x14a   : > { %v897_v49 = vmul.f32 %v882_v41, %v882_v41  ;;  %v903_v56 = vmul.f32 %v891_v54, %v878_v36  ;;  %v907_v58 = vmul.f32 %v891_v54, %v882_v41 }
 0x14b   : > { %v904_v57 = vmul.f32 %v895_v55, %v882_v41  ;;  %v908_v59 = vmul.f32 %v895_v55, %v874_v25 }
 0x14c   : > { %v898_v43 = vsub.f32 %v896_v46, %v897_v49 }
 0x14d   : > { %v905_v1 = vadd.f32 %v904_v57, %v903_v56  ;;  %v909_v2 = vadd.f32 %v908_v59, %v907_v58 }
 0x14e   : > { %1454 = vrcp.f32 %v898_v43 }
 0x15b   : > { %v1455_v60 = vpop.eup %1454 }
 0x15c   : > { %v900_v61 = vmul.f32 %v1455_v60, %v898_v43 }
 0x15e   : > { %v901_v9 = vsub.f32 2.0, %v900_v61 }
 0x160   : > { %v902_v4 = vmul.f32 %v1455_v60, %v901_v9 }
 0x162   : > { %v906_v5 = vmul.f32 %v905_v1, %v902_v4  ;;  %v2214_v6 = vmul.f32 %v909_v2, %v902_v4 }
 0x164   : > { %v913_v63 = vmul.f32 %v906_v5, %v2176_v62  ;;  %v911_v3 = vmul.f32 %v906_v5, %v2174_v8  ;;  %915 = vst [vmem:[%s493_s22] sm:$0xff] %v906_v5  ;;  %v916_v0 = vmul.f32 %v906_v5, %v2189_v20  ;;  %v918_v7 = vmul.f32 %v2214_v6, %v834_v31 }
 0x165   : > { %v920_v10 = vmul.f32 %v906_v5, %v2191_v21  ;;  %v922_v62 = vmul.f32 %v2214_v6, %v836_v32  ;;  %v924_v8 = vmul.f32 %v906_v5, %v2195_v27 }
 0x166   : > { %914 = vst [vmem:[%s486_s10] sm:$0xff] %v913_v63  ;;  %912 = vst [vmem:[%s479_s12] sm:$0xff] %v911_v3  ;;  %v917_v11 = vadd.f32 %v916_v0, %v883_v39  ;;  %s1766_s10 = smov [#allocation13]  }
 0x167   : > { %v921_v13 = vadd.f32 %v920_v10, %v885_v40  ;;  %v925_v14 = vadd.f32 %v924_v8, %v888_v42  ;;  %s1585_s12 = sshll.u32 %s1766_s10, 4  ;;  %s1586_s12 = int_to_ptr.vmem [resolvable:$false] %s1585_s12 }
 0x168   : > { %s1587_s22 = scalar_lea.vmem %s1586_s12, 256  ;;  %p1588_p1 = scmp.lt.s32.totalorder %s2216_s11, %s1586_s12 }
 0x169   : > { %p1589_p4 = scmp.lt.s32.totalorder %s1587_s22, %s1581_s29 }
 0x16b   : > { %p1590_p5 = por %p1589_p4, %p1588_p1 }
 0x16d   : > { %p1591_p6 = pnand %p1590_p5, %p1584_p2 }
 0x16f   : > { %1594 = shalt.err (!%p1591_p6)
}
 0x170   : > { %s1595_s19 = scalar_lea.hbm %s2229_s13, 128  ;;  %s1599_s20 = scalar_lea.hbm %s2371_s6, 256 }
 0x171   : > { %p1596_p9 = scmp.ne.s32.totalorder %s2229_s13, %s1595_s19  ;;  %p1600_p0 = scmp.lt.s32.totalorder %s2229_s13, %s2371_s6 }
 0x172   : > { %p1601_p8 = scmp.lt.s32.totalorder %s1599_s20, %s1595_s19 }
 0x173   : > { %p1597_p10 = pnand %p1596_p9, %p1911_p12 }
 0x174   : > { %p1602_p7 = por %p1601_p8, %p1600_p0 }
 0x175   : > { %p1598_p3 = pneg %p1597_p10 }
 0x177   : > { %p1603_p11 = pnand %p1602_p7, %p1598_p3 }
 0x179   : > { %1606 = shalt.err (!%p1603_p11)
}
 0x17a   : > { %1344 = dma.vmem_to_hbm [thread:$0]  (%p1911_p12), %s2216_s11, 128, %s2229_s13, %s2250_s27   ;;  %v919_v16 = vsub.f32 %v917_v11, %v918_v7 }
 0x17b   : > { %s941_s23 = scalar_lea.sflag [#allocation4], %s1982_s14  ;;  %s1607_s18 = scalar_lea.vmem %s2218_s9, 128 }
 0x17c   : > { %p1608_p2 = scmp.ne.s32.totalorder %s2218_s9, %s1607_s18  ;;  %s1767_s29 = smov [#allocation12]  }
 0x17d   : > { %s1611_s10 = sshll.u32 %s1767_s29, 4  ;;  %s1612_s10 = int_to_ptr.vmem [resolvable:$false] %s1611_s10 }
 0x17e   : > { %p1609_p1 = pnand %p1608_p2, %p1911_p12  ;;  %s1613_s12 = scalar_lea.vmem %s1612_s10, 256 }
 0x17f   : > { %p1614_p5 = scmp.lt.s32.totalorder %s2218_s9, %s1612_s10  ;;  %p1615_p6 = scmp.lt.s32.totalorder %s1613_s12, %s1607_s18 }
 0x180   : > { %p1610_p4 = pneg %p1609_p1 }
 0x181   : > { %p1616_p9 = por %p1615_p6, %p1614_p5 }
 0x183   : > { %p1617_p10 = pnand %p1616_p9, %p1610_p4 }
 0x185   : > { %1620 = shalt.err (!%p1617_p10)
}
 0x186   : > { %s1621_s11 = scalar_lea.hbm %s2238_s17, 128  ;;  %s1625_s19 = scalar_lea.hbm %s2370_s5, 256 }
 0x187   : > { %p1622_p3 = scmp.ne.s32.totalorder %s2238_s17, %s1621_s11  ;;  %p1626_p7 = scmp.lt.s32.totalorder %s2238_s17, %s2370_s5 }
 0x188   : > { %p1627_p11 = scmp.lt.s32.totalorder %s1625_s19, %s1621_s11 }
 0x189   : > { %p1623_p0 = pnand %p1622_p3, %p1911_p12 }
 0x18a   : > { %p1628_p2 = por %p1627_p11, %p1626_p7 }
 0x18b   : > { %p1624_p8 = pneg %p1623_p0 }
 0x18d   : > { %p1629_p1 = pnand %p1628_p2, %p1624_p8 }
 0x18f   : > { %1632 = shalt.err (!%p1629_p1)
}
 0x190   : > { %1343 = dma.vmem_to_hbm [thread:$0]  (%p1911_p12), %s2218_s9, 128, %s2238_s17, %s941_s23   ;;  %v923_v17 = vsub.f32 %v921_v13, %v922_v62  ;;  %v926_v18 = vsub.f32 %v925_v14, %v2214_v6 }
 0x191   : > { %s1633_s20 = scalar_lea.vmem %s2240_s26, 128  ;;  %s1768_s1 = smov [#allocation15]  }
 0x192   : > { %p1634_p4 = scmp.ne.s32.totalorder %s2240_s26, %s1633_s20  ;;  %s1637_s16 = sshll.u32 %s1768_s1, 4  ;;  %s1638_s16 = int_to_ptr.vmem [resolvable:$false] %s1637_s16 }
 0x193   : > { %s1639_s18 = scalar_lea.vmem %s1638_s16, 256  ;;  %p1640_p9 = scmp.lt.s32.totalorder %s2240_s26, %s1638_s16 }
 0x194   : > { %p1635_p5 = pnand %p1634_p4, %p1911_p12  ;;  %p1641_p10 = scmp.lt.s32.totalorder %s1639_s18, %s1633_s20 }
 0x196   : > { %p1636_p6 = pneg %p1635_p5  ;;  %p1642_p3 = por %p1641_p10, %p1640_p9 }
 0x198   : > { %p1643_p0 = pnand %p1642_p3, %p1636_p6 }
 0x19a   : > { %1646 = shalt.err (!%p1643_p0)
}
 0x19b   : > { %s1647_s9 = scalar_lea.hbm %s2246_s2, 128  ;;  %s1651_s29 = scalar_lea.hbm %s2372_s7, 256 }
 0x19c   : > { %p1648_p8 = scmp.ne.s32.totalorder %s2246_s2, %s1647_s9  ;;  %p1652_p2 = scmp.lt.s32.totalorder %s2246_s2, %s2372_s7 }
 0x19d   : > { %p1653_p1 = scmp.lt.s32.totalorder %s1651_s29, %s1647_s9 }
 0x19e   : > { %p1649_p7 = pnand %p1648_p8, %p1911_p12 }
 0x19f   : > { %p1654_p4 = por %p1653_p1, %p1652_p2 }
 0x1a0   : > { %p1650_p11 = pneg %p1649_p7 }
 0x1a2   : > { %p1655_p5 = pnand %p1654_p4, %p1650_p11 }
 0x1a4   : > { %1658 = shalt.err (!%p1655_p5)
}
 0x1a5   : > { %1345 = dma.vmem_to_hbm [thread:$0]  (%p1911_p12), %s2240_s26, 128, %s2246_s2, %s2250_s27   ;;  %v927_v19 = vmul.f32 %v919_v16, %v919_v16  ;;  %v928_v20 = vmul.f32 %v923_v17, %v923_v17  ;;  %v930_v21 = vmul.f32 %v926_v18, %v926_v18 }
 0x1a6   : > { %s500_s11 = scalar_lea.vmem [#allocation16], %s1985_s15  ;;  %s1010_s27 = scalar_lea.hbm %s2373_s8, %s2212_s24 }
 0x1a7   : > { %v929_v22 = vadd.f32 %v928_v20, %v927_v19  ;;  %s1012_s13 = sshll.u32 %s500_s11, 4  ;;  %s956_s22 = scalar_lea.sflag [#allocation17], %s1982_s14  ;;  %s2317_s13 = int_to_ptr.vmem [resolvable:$true] %s1012_s13 }
 0x1a8   : > { %s1659_s15 = scalar_lea.vmem %s2317_s13, 128  ;;  %s1769_s19 = smov [#allocation16]  }
 0x1a9   : > { %v931_v24 = vadd.f32 %v930_v21, %v929_v22  ;;  %p1660_p6 = scmp.ne.s32.totalorder %s2317_s13, %s1659_s15  ;;  %s1663_s25 = sshll.u32 %s1769_s19, 4  ;;  %s1664_s25 = int_to_ptr.vmem [resolvable:$false] %s1663_s25 }
 0x1aa   : > { %s1665_s30 = scalar_lea.vmem %s1664_s25, 256  ;;  %p1666_p3 = scmp.lt.s32.totalorder %s2317_s13, %s1664_s25 }
 0x1ab   : > { %1456 = vrsqrt.f32 %v931_v24  ;;  %vm934_vm0 = vcmp.eq.f32.partialorder %v931_v24, inf  ;;  %v937_v27 = vand.u32 2147483648, %v931_v24  ;;  %vm936_vm1 = vcmp.eq.f32.partialorder %v931_v24, 0.0  ;;  %p1661_p9 = pnand %p1660_p6, %p1911_p12  ;;  %p1667_p0 = scmp.lt.s32.totalorder %s1665_s30, %s1659_s15 }
 0x1ad   : > { %p1662_p10 = pneg %p1661_p9  ;;  %p1668_p8 = por %p1667_p0, %p1666_p3 }
 0x1af   : > { %p1669_p7 = pnand %p1668_p8, %p1662_p10 }
 0x1b8   : > { %v1457_v26 = vpop.eup %1456 }
 0x1b9   : > { %v933_v12 = vmul.f32 %v1457_v26, %v931_v24 }
 0x1bb   : > { %v935_v29 = vsel %vm934_vm0, %v931_v24, %v933_v12 }
 0x1bc   : > { %v938_v30 = vsel %vm936_vm1, %v937_v27, %v935_v29 }
 0x1bd   : > { %939 = vst [vmem:[%s500_s11] sm:$0xff] %v938_v30 }
 0x1be   : > { %1672 = shalt.err (!%p1669_p7)
}
 0x1bf   : > { %s1673_s20 = scalar_lea.hbm %s1010_s27, 128  ;;  %s1677_s1 = scalar_lea.hbm %s2373_s8, 256 }
 0x1c0   : > { %p1674_p11 = scmp.ne.s32.totalorder %s1010_s27, %s1673_s20  ;;  %p1678_p4 = scmp.lt.s32.totalorder %s1010_s27, %s2373_s8 }
 0x1c1   : > { %p1679_p5 = scmp.lt.s32.totalorder %s1677_s1, %s1673_s20 }
 0x1c2   : > { %p1675_p2 = pnand %p1674_p11, %p1911_p12 }
 0x1c3   : > { %p1680_p6 = por %p1679_p5, %p1678_p4 }
 0x1c4   : > { %p1676_p1 = pneg %p1675_p2 }
 0x1c6   : > { %p1681_p9 = pnand %p1680_p6, %p1676_p1 }
 0x1c8   : > { %1684 = shalt.err (!%p1681_p9)
}
 0x1c9   : > { %1346 = dma.vmem_to_hbm [thread:$0]  (%p1911_p12), %s2317_s13, 128, %s1010_s27, %s956_s22  }
 0x1ca PF: > { %s2403_s9 = sld [smem:[#allocation25_spill]] }
 0x1cb   : > { %s2405_s23 = sld [smem:[#allocation28_spill]] }
 0x1d0   : > { %s1024_s29 = sand.u32 1, %s2403_s9  }
 0x1d1   : > { %p2406_p10 = scmp.ge.s32.totalorder %s2405_s23, 2  ;;  %s1025_s10 = scalar_lea.sflag [#allocation4], %s1024_s29 }
 0x1d3   : > { %p1369_p3 = pnand %p2406_p10, %p1915_p13 }
 0x1d5   : > { %p1370_p0 = pneg %p1369_p3 }
 0x1d7   : > { %1726 = dma.done.wait (%p1370_p0), %s1025_s10, 128  }
 0x1d8   : > { %1728 = vsyncadd (%p1370_p0), %s1025_s10, 4294967168  ;;  %s2407_s12 = sadd.s32 4294967294, %s2405_s23  }
 0x1d9   : > { %s1033_s11 = sand.u32 1, %s2407_s12  }
 0x1da   : > { %s1034_s26 = scalar_lea.sflag [#allocation14], %s1033_s11 }
 0x1db   : > { %1730 = dma.done.wait (%p1370_p0), %s1034_s26, 256  }
 0x1dc   : > { %1732 = vsyncadd (%p1370_p0), %s1034_s26, 4294967040  ;;  %s1052_s21 = scalar_lea.sflag [#allocation17], %s1024_s29 }
 0x1dd   : > { %1734 = dma.done.wait (%p1370_p0), %s1052_s21, 128  }
 0x1de   : > { %1736 = vsyncadd (%p1370_p0), %s1052_s21, 4294967168  ;;  %s38_s10 = sadd.s32 1, %s2405_s23   ;;  %s2408_s13 = sld [smem:[#allocation26_spill]] }
 0x1df   : > { %p35_p12 = scmp.ge.s32.totalorder %s38_s10, 4   ;;  %s2409_s29 = sld [smem:[#allocation30_spill]] }
 0x1e0   : > { %s2410_s30 = sld [smem:[#allocation27_spill]]  ;;  %s2412_s27 = smov %s1743_s28 }
 0x1e1   : > { %s2411_s9 = sld [smem:[#allocation29_spill]]  ;;  %37 = sbr.rel (!%p35_p12) target bundleno = 18 (0x12), region = 176 }
 0x1e4   : > { %s2413_s28 = smov %s2408_s13 }
 0x1e6   :  { %1057 = vsyncpa [#allocation3], 1 }
 0x1e7   :  { %1059 = vsyncpa [#allocation3 + $0x1], 1 }
 0x1e8   :  { %1060 = vsyncpa [#allocation8], 1 }
 0x1e9   :  { %1062 = vsyncpa [#allocation8 + $0x1], 1 }
 0x1ea   :  { %1063 = vsyncpa [#allocation11], 1 }
 0x1eb   :  { %1065 = vsyncpa [#allocation11 + $0x1], 1 }
 0x1ec   :  { %1066 = vsyncpa [#allocation4], 1 }
 0x1ed   :  { %1068 = vsyncpa [#allocation4 + $0x1], 1 }
 0x1ee   :  { %1069 = vsyncpa [#allocation14], 1 }
 0x1ef   :  { %1071 = vsyncpa [#allocation14 + $0x1], 1 }
 0x1f0   :  { %1072 = vsyncpa [#allocation17], 1 }
 0x1f1   :  { %1074 = vsyncpa [#allocation17 + $0x1], 1 }
 0x1f2   :  { %1075 = vsyncpa [#allocation5], 1 }
 0x1f3   :  { %1077 = vsyncpa [#allocation5 + $0x1], 1 }

</bundles_post_ra>
